<compile_context>
chip_gen: v5e
topology: v5e:2x2
jax: 0.10.0
libtpu: 0.0.40
codegen_flags: <defaults>
</compile_context>

<pallas_src>
import jax
import jax.numpy as jnp
from jax.experimental import pallas as pl
from jax.experimental.pallas import tpu as pltpu

KP = 128  # packed K width for conv1/conv2 (one MXU K tile); needs 9*c_out <= KP


# ----------------------------- kernel ---------------------------------------

def _base_layer_kernel(xpr_ref, wp_ref, w1_ref, w2_ref, bn_ref, o_ref):
    """Fused BaseLayer forward for a block of bb images.

    xpr_ref: (bb, H+2, (W+2)//2, 2*Ci)  padded NHWC input, W folded into (even,odd) pairs
    wp_ref : (12*Ci, 2*Co)   bf16 conv0 weights for [even | odd] pooled phases
    w1_ref : (KP, Co)        bf16 conv1 weights, rows (kh*3+kw)*Co+cin, zero-padded to KP
    w2_ref : (KP, Co)        bf16 conv2 weights, same packing
    bn_ref : (6, Co)         f32 [s0, s0*b0+t0, s1, t1, s2, t2] per-channel affine
    o_ref  : (bb, H//2, W//2, Co)  f32 output (exact channel count, NHWC)
    """
    bb, hp, wpairs, two_ci = xpr_ref.shape
    ci = two_ci // 2
    h = hp - 2                   # pre-pool height
    wh = wpairs - 1              # pooled width  (= W//2)
    hh = h // 2                  # pooled height (= H//2)
    co = o_ref.shape[3]
    kp = w1_ref.shape[0]

    def dot(a, b):
        # one bf16 MXU pass, f32 accumulation (default precision; no HIGHEST)
        return jnp.dot(a.astype(jnp.bfloat16), b, preferred_element_type=jnp.float32)

    bn = bn_ref[...]
    s0, t0 = bn[0], bn[1]        # conv0 bias already folded into t0
    s1, t1 = bn[2], bn[3]
    s2, t2 = bn[4], bn[5]

    # ---- stage 1: conv0(3x3) + maxpool(2,2) + BN + ReLU, one MXU dot -----------------
    # Pooled output column j consumes padded columns {2j..2j+3}; window tap t lives at
    # lane offset (t%2)*ci of pair-column j + t//2.  Even/odd conv phases are the two
    # co-wide halves of wp, so the 2x2 pool is two jnp.maximum's.
    xv = xpr_ref[...]                                            # (bb, H+2, W//2+1, 2*Ci)
    taps = []
    for kh in range(3):
        for t in range(4):
            j0, c0 = t // 2, (t % 2) * ci
            taps.append(xv[:, kh:kh + h, j0:j0 + wh, c0:c0 + ci])
    im0 = jnp.concatenate(taps, axis=-1)                         # (bb, H, W//2, 12*Ci)
    y = dot(im0.reshape(bb * h * wh, 12 * ci), wp_ref[...])      # (bb*H*W//2, 2*Co)
    y = y.reshape(bb, h, wh, 2 * co)
    colmax = jnp.maximum(y[..., :co], y[..., co:])               # pool over W (even/odd)
    yr = colmax.reshape(bb, hh, 2, wh, co)
    pooled = jnp.maximum(yr[:, :, 0], yr[:, :, 1])               # pool over H
    x_id = jnp.maximum(pooled * s0 + t0, 0.0)                    # BN (bias folded) + ReLU

    # ---- 3x3 conv with K packed to one 128-lane group (9*co <= 128) ------------------
    def conv3x3(act, w_ref):
        zr = jnp.zeros((bb, 1, wh, co), jnp.float32)
        zc = jnp.zeros((bb, hh + 2, 1, co), jnp.float32)
        xp = jnp.concatenate([zr, act, zr], axis=1)              # pad H
        xp = jnp.concatenate([zc, xp, zc], axis=2)               # pad W -> (bb,hh+2,wh+2,co)
        pieces = [xp[:, kh:kh + hh, kw:kw + wh, :]
                  for kh in range(3) for kw in range(3)]         # 9 x (bb, hh, wh, co)
        if kp > 9 * co:                                          # pad K lanes to KP
            pieces.append(jnp.zeros((bb, hh, wh, kp - 9 * co), jnp.float32))
        im = jnp.concatenate(pieces, axis=-1)                    # (bb, hh, wh, KP)
        out = dot(im.reshape(bb * hh * wh, kp), w_ref[...])      # (bb*hh*wh, co)
        return out.reshape(bb, hh, wh, co)

    # ---- stage 2: conv1 + BN + ReLU ---------------------------------------------------
    h1 = jnp.maximum(conv3x3(x_id, w1_ref) * s1 + t1, 0.0)

    # ---- stage 3: conv2 + BN, residual adds -------------------------------------------
    r = conv3x3(h1, w2_ref) * s2 + t2
    res = jnp.maximum(r + x_id, 0.0)                             # BaseBlock: +identity; ReLU
    o_ref[...] = res + x_id                                      # BaseLayer: + x_id


# ----------------------------- wrapper ---------------------------------------

def base_layer_forward(x_nchw, w0, b0, s0, t0, w1, s1, t1, w2, s2, t2,
                       images_per_step=None):
    n, ci, h, w = x_nchw.shape
    co = w0.shape[-1]
    assert h % 2 == 0 and w % 2 == 0, "MaxPool(2,2) requires even H and W"
    assert 9 * co <= KP, "K-packing needs 9*c_out <= 128 (split per kh for larger c_out)"
    hh, wh = h // 2, w // 2

    # Fold images into the matmul M dimension, but keep >= 2 grid steps so both
    # v7x TensorCores get work under megacore sharding.
    if images_per_step is None:
        images_per_step = max(1, n // 2)
    bb = images_per_step
    assert n % bb == 0

    # ---- host-side parameter algebra (one-time, plain JAX) ----
    bn = jnp.stack([s0, s0 * b0 + t0,              # conv0 bias folded into BN shift
                    s1, t1, s2, t2]).astype(jnp.float32)          # (6, co)

    # conv0 -> fused conv+pool weights: even phase uses window taps {0,1,2}, odd {1,2,3};
    # stacking both along the output axis lets one dot emit the pair the 2x2 pool reduces.
    zcol = jnp.zeros((3, 1, ci, co), w0.dtype)
    w_even = jnp.concatenate([w0, zcol], axis=1).reshape(12 * ci, co)
    w_odd = jnp.concatenate([zcol, w0], axis=1).reshape(12 * ci, co)
    wp = jnp.concatenate([w_even, w_odd], axis=1).astype(jnp.bfloat16)   # (12*ci, 2*co)

    def pack_w(wt):                                # HWIO (3,3,co,co) -> (KP, co), bf16
        wt = wt.reshape(9 * co, co)                # row = (kh*3+kw)*co + cin
        return jnp.pad(wt, ((0, KP - 9 * co), (0, 0))).astype(jnp.bfloat16)

    w1p, w2p = pack_w(w1), pack_w(w2)

    # ---- input layout: NCHW -> NHWC, zero-pad, fold W into (even,odd) column pairs ----
    x = jnp.transpose(x_nchw, (0, 2, 3, 1))
    xp = jnp.pad(x, ((0, 0), (1, 1), (1, 1), (0, 0)))            # (n, h+2, w+2, ci)
    xpr = xp.reshape(n, h + 2, (w + 2) // 2, 2 * ci)

    out_nhwc = pl.pallas_call(
        _base_layer_kernel,
        out_shape=jax.ShapeDtypeStruct((n, hh, wh, co), jnp.float32),
        grid=(n // bb,),
        in_specs=[
            pl.BlockSpec((bb, h + 2, (w + 2) // 2, 2 * ci), lambda b: (b, 0, 0, 0)),
            pl.BlockSpec((12 * ci, 2 * co), lambda b: (0, 0)),
            pl.BlockSpec((KP, co), lambda b: (0, 0)),
            pl.BlockSpec((KP, co), lambda b: (0, 0)),
            pl.BlockSpec((6, co), lambda b: (0, 0)),
        ],
        out_specs=pl.BlockSpec((bb, hh, wh, co), lambda b: (b, 0, 0, 0)),
        compiler_params=pltpu.CompilerParams(
            dimension_semantics=("parallel",)),
    )(xpr, wp, w1p, w2p, bn)

    return jnp.transpose(out_nhwc, (0, 3, 1, 2))   # NHWC -> NCHW


# ----------------------------- reference --------------------------------------

def _reference(x_nchw, w0, b0, s0, t0, w1, s1, t1, w2, s2, t2):
    # bf16-input / f32-accumulate convs: same MXU numerics the kernel uses.
    x = jnp.transpose(x_nchw, (0, 2, 3, 1))

    def conv(a, wt):
        return jax.lax.conv_general_dilated(
            a.astype(jnp.bfloat16), wt.astype(jnp.bfloat16), (1, 1), ((1, 1), (1, 1)),
            dimension_numbers=("NHWC", "HWIO", "NHWC"),
            preferred_element_type=jnp.float32)

    y = conv(x, w0) + b0
    y = jax.lax.reduce_window(y, -jnp.inf, jax.lax.max,
                              (1, 2, 2, 1), (1, 2, 2, 1), "VALID")
    x_id = jnp.maximum(y * s0 + t0, 0.0)
    h1 = jnp.maximum(conv(x_id, w1) * s1 + t1, 0.0)
    r = conv(h1, w2) * s2 + t2
    res = jnp.maximum(r + x_id, 0.0)
    return jnp.transpose(res + x_id, (0, 3, 1, 2))


# ----------------------------- main --------------------------------------------

if __name__ == "__main__":
    C_IN, C_OUT = 4, 8
    N, H, W = 2, 16, 16
    EPS = 1e-5

    key = jax.random.PRNGKey(0)
    ks = jax.random.split(key, 8)

    def bn_fold(k, c):
        k1, k2, k3, k4 = jax.random.split(k, 4)
        gamma = 1.0 + 0.1 * jax.random.normal(k1, (c,), jnp.float32)
        beta = 0.1 * jax.random.normal(k2, (c,), jnp.float32)
        mean = 0.1 * jax.random.normal(k3, (c,), jnp.float32)
        var = 0.5 + jax.random.uniform(k4, (c,), jnp.float32)
        scale = gamma / jnp.sqrt(var + EPS)
        shift = beta - mean * scale
        return scale, shift

    w0 = 0.2 * jax.random.normal(ks[0], (3, 3, C_IN, C_OUT), jnp.float32)   # HWIO
    b0 = 0.1 * jax.random.normal(ks[1], (C_OUT,), jnp.float32)
    s0, t0 = bn_fold(ks[2], C_OUT)
    w1 = 0.2 * jax.random.normal(ks[3], (3, 3, C_OUT, C_OUT), jnp.float32)
    s1, t1 = bn_fold(ks[4], C_OUT)
    w2 = 0.2 * jax.random.normal(ks[5], (3, 3, C_OUT, C_OUT), jnp.float32)
    s2, t2 = bn_fold(ks[6], C_OUT)

    x = jax.random.normal(ks[7], (N, C_IN, H, W), jnp.float32)   # NCHW, like PyTorch

    fwd = jax.jit(base_layer_forward)
    out = fwd(x, w0, b0, s0, t0, w1, s1, t1, w2, s2, t2)
    out = jax.block_until_ready(out)

    ref = _reference(x, w0, b0, s0, t0, w1, s1, t1, w2, s2, t2)
    assert out.shape == (N, C_OUT, H // 2, W // 2), out.shape
    max_err = float(jnp.max(jnp.abs(out - ref)))
    assert max_err < 5e-3, f"max abs error {max_err}"

    print("KERNEL_OK")
</pallas_src>

<mosaic_0001>
module attributes {stable_mosaic.version = 11 : i64} {
  func.func @_base_layer_kernel(%arg0: i32, %arg1: memref<1x18x9x8xf32, #tpu.memory_space<vmem>>, %arg2: memref<48x16xbf16, #tpu.memory_space<vmem>>, %arg3: memref<128x8xbf16, #tpu.memory_space<vmem>>, %arg4: memref<128x8xbf16, #tpu.memory_space<vmem>>, %arg5: memref<6x8xf32, #tpu.memory_space<vmem>>, %arg6: memref<1x8x8x8xf32, #tpu.memory_space<vmem>>) attributes {dimension_semantics = [#tpu.dimension_semantics<parallel>], iteration_bounds = array<i64: 2>, scalar_prefetch = 0 : i64, scratch_operands = 0 : i64, tpu.core_type = #tpu.core_type<tc>, window_params = [{transform_indices = @transform_0, window_bounds = array<i64: 1, 18, 9, 8>}, {pipeline_mode = #tpu.pipeline_mode<synchronous>, transform_indices = @transform_1, window_bounds = array<i64: 48, 16>}, {pipeline_mode = #tpu.pipeline_mode<synchronous>, transform_indices = @transform_2, window_bounds = array<i64: 128, 8>}, {pipeline_mode = #tpu.pipeline_mode<synchronous>, transform_indices = @transform_3, window_bounds = array<i64: 128, 8>}, {pipeline_mode = #tpu.pipeline_mode<synchronous>, transform_indices = @transform_4, window_bounds = array<i64: 6, 8>}, {transform_indices = @transform_5, window_bounds = array<i64: 1, 8, 8, 8>}]} {
    %c0 = arith.constant 0 : index
    %c0_0 = arith.constant 0 : index
    %0 = vector.load %arg5[%c0, %c0_0] : memref<6x8xf32, #tpu.memory_space<vmem>>, vector<6x8xf32>
    %1 = vector.extract_strided_slice %0 {offsets = [0, 0], sizes = [1, 8], strides = [1, 1]} : vector<6x8xf32> to vector<1x8xf32>
    %2 = vector.shape_cast %1 : vector<1x8xf32> to vector<8xf32>
    %3 = vector.extract_strided_slice %0 {offsets = [1, 0], sizes = [1, 8], strides = [1, 1]} : vector<6x8xf32> to vector<1x8xf32>
    %4 = vector.shape_cast %3 : vector<1x8xf32> to vector<8xf32>
    %5 = vector.extract_strided_slice %0 {offsets = [2, 0], sizes = [1, 8], strides = [1, 1]} : vector<6x8xf32> to vector<1x8xf32>
    %6 = vector.shape_cast %5 : vector<1x8xf32> to vector<8xf32>
    %7 = vector.extract_strided_slice %0 {offsets = [3, 0], sizes = [1, 8], strides = [1, 1]} : vector<6x8xf32> to vector<1x8xf32>
    %8 = vector.shape_cast %7 : vector<1x8xf32> to vector<8xf32>
    %9 = vector.extract_strided_slice %0 {offsets = [4, 0], sizes = [1, 8], strides = [1, 1]} : vector<6x8xf32> to vector<1x8xf32>
    %10 = vector.shape_cast %9 : vector<1x8xf32> to vector<8xf32>
    %11 = vector.extract_strided_slice %0 {offsets = [5, 0], sizes = [1, 8], strides = [1, 1]} : vector<6x8xf32> to vector<1x8xf32>
    %12 = vector.shape_cast %11 : vector<1x8xf32> to vector<8xf32>
    %c0_1 = arith.constant 0 : index
    %c0_2 = arith.constant 0 : index
    %c0_3 = arith.constant 0 : index
    %c0_4 = arith.constant 0 : index
    %13 = vector.load %arg1[%c0_1, %c0_2, %c0_3, %c0_4] : memref<1x18x9x8xf32, #tpu.memory_space<vmem>>, vector<1x18x9x8xf32>
    %14 = vector.extract_strided_slice %13 {offsets = [0, 0, 0, 0], sizes = [1, 16, 8, 4], strides = [1, 1, 1, 1]} : vector<1x18x9x8xf32> to vector<1x16x8x4xf32>
    %15 = vector.extract_strided_slice %13 {offsets = [0, 0, 0, 4], sizes = [1, 16, 8, 4], strides = [1, 1, 1, 1]} : vector<1x18x9x8xf32> to vector<1x16x8x4xf32>
    %16 = vector.extract_strided_slice %13 {offsets = [0, 0, 1, 0], sizes = [1, 16, 8, 4], strides = [1, 1, 1, 1]} : vector<1x18x9x8xf32> to vector<1x16x8x4xf32>
    %17 = vector.extract_strided_slice %13 {offsets = [0, 0, 1, 4], sizes = [1, 16, 8, 4], strides = [1, 1, 1, 1]} : vector<1x18x9x8xf32> to vector<1x16x8x4xf32>
    %18 = vector.extract_strided_slice %13 {offsets = [0, 1, 0, 0], sizes = [1, 16, 8, 4], strides = [1, 1, 1, 1]} : vector<1x18x9x8xf32> to vector<1x16x8x4xf32>
    %19 = vector.extract_strided_slice %13 {offsets = [0, 1, 0, 4], sizes = [1, 16, 8, 4], strides = [1, 1, 1, 1]} : vector<1x18x9x8xf32> to vector<1x16x8x4xf32>
    %20 = vector.extract_strided_slice %13 {offsets = [0, 1, 1, 0], sizes = [1, 16, 8, 4], strides = [1, 1, 1, 1]} : vector<1x18x9x8xf32> to vector<1x16x8x4xf32>
    %21 = vector.extract_strided_slice %13 {offsets = [0, 1, 1, 4], sizes = [1, 16, 8, 4], strides = [1, 1, 1, 1]} : vector<1x18x9x8xf32> to vector<1x16x8x4xf32>
    %22 = vector.extract_strided_slice %13 {offsets = [0, 2, 0, 0], sizes = [1, 16, 8, 4], strides = [1, 1, 1, 1]} : vector<1x18x9x8xf32> to vector<1x16x8x4xf32>
    %23 = vector.extract_strided_slice %13 {offsets = [0, 2, 0, 4], sizes = [1, 16, 8, 4], strides = [1, 1, 1, 1]} : vector<1x18x9x8xf32> to vector<1x16x8x4xf32>
    %24 = vector.extract_strided_slice %13 {offsets = [0, 2, 1, 0], sizes = [1, 16, 8, 4], strides = [1, 1, 1, 1]} : vector<1x18x9x8xf32> to vector<1x16x8x4xf32>
    %25 = vector.extract_strided_slice %13 {offsets = [0, 2, 1, 4], sizes = [1, 16, 8, 4], strides = [1, 1, 1, 1]} : vector<1x18x9x8xf32> to vector<1x16x8x4xf32>
    %26 = tpu.concatenate %14, %15, %16, %17, %18, %19, %20, %21, %22, %23, %24, %25 in 3 : vector<1x16x8x4xf32>, vector<1x16x8x4xf32>, vector<1x16x8x4xf32>, vector<1x16x8x4xf32>, vector<1x16x8x4xf32>, vector<1x16x8x4xf32>, vector<1x16x8x4xf32>, vector<1x16x8x4xf32>, vector<1x16x8x4xf32>, vector<1x16x8x4xf32>, vector<1x16x8x4xf32>, vector<1x16x8x4xf32> -> vector<1x16x8x48xf32>
    %27 = vector.shape_cast %26 : vector<1x16x8x48xf32> to vector<128x48xf32>
    %c0_5 = arith.constant 0 : index
    %c0_6 = arith.constant 0 : index
    %28 = vector.load %arg2[%c0_5, %c0_6] : memref<48x16xbf16, #tpu.memory_space<vmem>>, vector<48x16xbf16>
    %29 = arith.truncf %27 : vector<128x48xf32> to vector<128x48xbf16>
    %cst = arith.constant dense<0.000000e+00> : vector<128x16xf32>
    %30 = tpu.matmul %29, %28, %cst {dimension_numbers = #tpu.dot_dimension_numbers<[1], [0], [0], [1], [0, 0, 1, 1], [], []>} : vector<128x48xbf16>, vector<48x16xbf16>, vector<128x16xf32> -> vector<128x16xf32>
    %31 = vector.shape_cast %30 : vector<128x16xf32> to vector<1x16x8x16xf32>
    %32 = vector.extract_strided_slice %31 {offsets = [0, 0, 0, 0], sizes = [1, 16, 8, 8], strides = [1, 1, 1, 1]} : vector<1x16x8x16xf32> to vector<1x16x8x8xf32>
    %33 = vector.extract_strided_slice %31 {offsets = [0, 0, 0, 8], sizes = [1, 16, 8, 8], strides = [1, 1, 1, 1]} : vector<1x16x8x16xf32> to vector<1x16x8x8xf32>
    %34 = arith.maximumf %32, %33 : vector<1x16x8x8xf32>
    %35 = vector.shape_cast %34 : vector<1x16x8x8xf32> to vector<1x8x2x8x8xf32>
    %36 = vector.extract_strided_slice %35 {offsets = [0, 0, 0, 0, 0], sizes = [1, 8, 1, 8, 8], strides = [1, 1, 1, 1, 1]} : vector<1x8x2x8x8xf32> to vector<1x8x1x8x8xf32>
    %37 = vector.shape_cast %36 : vector<1x8x1x8x8xf32> to vector<1x8x8x8xf32>
    %38 = vector.extract_strided_slice %35 {offsets = [0, 0, 1, 0, 0], sizes = [1, 8, 1, 8, 8], strides = [1, 1, 1, 1, 1]} : vector<1x8x2x8x8xf32> to vector<1x8x1x8x8xf32>
    %39 = vector.shape_cast %38 : vector<1x8x1x8x8xf32> to vector<1x8x8x8xf32>
    %40 = arith.maximumf %37, %39 : vector<1x8x8x8xf32>
    %41 = vector.shape_cast %2 : vector<8xf32> to vector<1x1x1x8xf32>
    %42 = vector.broadcast %41 : vector<1x1x1x8xf32> to vector<1x8x8x8xf32>
    %43 = arith.mulf %40, %42 : vector<1x8x8x8xf32>
    %44 = vector.shape_cast %4 : vector<8xf32> to vector<1x1x1x8xf32>
    %45 = vector.broadcast %44 : vector<1x1x1x8xf32> to vector<1x8x8x8xf32>
    %46 = arith.addf %43, %45 : vector<1x8x8x8xf32>
    %cst_7 = arith.constant 0.000000e+00 : f32
    %47 = vector.broadcast %cst_7 : f32 to vector<1x8x8x8xf32>
    %48 = arith.maximumf %46, %47 : vector<1x8x8x8xf32>
    %cst_8 = arith.constant 0.000000e+00 : f32
    %49 = vector.broadcast %cst_8 : f32 to vector<1x1x8x8xf32>
    %cst_9 = arith.constant 0.000000e+00 : f32
    %50 = vector.broadcast %cst_9 : f32 to vector<1x10x1x8xf32>
    %51 = tpu.concatenate %49, %48, %49 in 1 : vector<1x1x8x8xf32>, vector<1x8x8x8xf32>, vector<1x1x8x8xf32> -> vector<1x10x8x8xf32>
    %52 = tpu.concatenate %50, %51, %50 in 2 : vector<1x10x1x8xf32>, vector<1x10x8x8xf32>, vector<1x10x1x8xf32> -> vector<1x10x10x8xf32>
    %53 = vector.extract_strided_slice %52 {offsets = [0, 0, 0, 0], sizes = [1, 8, 8, 8], strides = [1, 1, 1, 1]} : vector<1x10x10x8xf32> to vector<1x8x8x8xf32>
    %54 = vector.extract_strided_slice %52 {offsets = [0, 0, 1, 0], sizes = [1, 8, 8, 8], strides = [1, 1, 1, 1]} : vector<1x10x10x8xf32> to vector<1x8x8x8xf32>
    %55 = vector.extract_strided_slice %52 {offsets = [0, 0, 2, 0], sizes = [1, 8, 8, 8], strides = [1, 1, 1, 1]} : vector<1x10x10x8xf32> to vector<1x8x8x8xf32>
    %56 = vector.extract_strided_slice %52 {offsets = [0, 1, 0, 0], sizes = [1, 8, 8, 8], strides = [1, 1, 1, 1]} : vector<1x10x10x8xf32> to vector<1x8x8x8xf32>
    %57 = vector.extract_strided_slice %52 {offsets = [0, 1, 1, 0], sizes = [1, 8, 8, 8], strides = [1, 1, 1, 1]} : vector<1x10x10x8xf32> to vector<1x8x8x8xf32>
    %58 = vector.extract_strided_slice %52 {offsets = [0, 1, 2, 0], sizes = [1, 8, 8, 8], strides = [1, 1, 1, 1]} : vector<1x10x10x8xf32> to vector<1x8x8x8xf32>
    %59 = vector.extract_strided_slice %52 {offsets = [0, 2, 0, 0], sizes = [1, 8, 8, 8], strides = [1, 1, 1, 1]} : vector<1x10x10x8xf32> to vector<1x8x8x8xf32>
    %60 = vector.extract_strided_slice %52 {offsets = [0, 2, 1, 0], sizes = [1, 8, 8, 8], strides = [1, 1, 1, 1]} : vector<1x10x10x8xf32> to vector<1x8x8x8xf32>
    %61 = vector.extract_strided_slice %52 {offsets = [0, 2, 2, 0], sizes = [1, 8, 8, 8], strides = [1, 1, 1, 1]} : vector<1x10x10x8xf32> to vector<1x8x8x8xf32>
    %cst_10 = arith.constant 0.000000e+00 : f32
    %62 = vector.broadcast %cst_10 : f32 to vector<1x8x8x56xf32>
    %63 = tpu.concatenate %53, %54, %55, %56, %57, %58, %59, %60, %61, %62 in 3 : vector<1x8x8x8xf32>, vector<1x8x8x8xf32>, vector<1x8x8x8xf32>, vector<1x8x8x8xf32>, vector<1x8x8x8xf32>, vector<1x8x8x8xf32>, vector<1x8x8x8xf32>, vector<1x8x8x8xf32>, vector<1x8x8x8xf32>, vector<1x8x8x56xf32> -> vector<1x8x8x128xf32>
    %64 = vector.shape_cast %63 : vector<1x8x8x128xf32> to vector<64x128xf32>
    %c0_11 = arith.constant 0 : index
    %c0_12 = arith.constant 0 : index
    %65 = vector.load %arg3[%c0_11, %c0_12] : memref<128x8xbf16, #tpu.memory_space<vmem>>, vector<128x8xbf16>
    %66 = arith.truncf %64 : vector<64x128xf32> to vector<64x128xbf16>
    %cst_13 = arith.constant dense<0.000000e+00> : vector<64x8xf32>
    %67 = tpu.matmul %66, %65, %cst_13 {dimension_numbers = #tpu.dot_dimension_numbers<[1], [0], [0], [1], [0, 0, 1, 1], [], []>} : vector<64x128xbf16>, vector<128x8xbf16>, vector<64x8xf32> -> vector<64x8xf32>
    %68 = vector.shape_cast %67 : vector<64x8xf32> to vector<1x8x8x8xf32>
    %69 = vector.shape_cast %6 : vector<8xf32> to vector<1x1x1x8xf32>
    %70 = vector.broadcast %69 : vector<1x1x1x8xf32> to vector<1x8x8x8xf32>
    %71 = arith.mulf %68, %70 : vector<1x8x8x8xf32>
    %72 = vector.shape_cast %8 : vector<8xf32> to vector<1x1x1x8xf32>
    %73 = vector.broadcast %72 : vector<1x1x1x8xf32> to vector<1x8x8x8xf32>
    %74 = arith.addf %71, %73 : vector<1x8x8x8xf32>
    %cst_14 = arith.constant 0.000000e+00 : f32
    %75 = vector.broadcast %cst_14 : f32 to vector<1x8x8x8xf32>
    %76 = arith.maximumf %74, %75 : vector<1x8x8x8xf32>
    %cst_15 = arith.constant 0.000000e+00 : f32
    %77 = vector.broadcast %cst_15 : f32 to vector<1x1x8x8xf32>
    %cst_16 = arith.constant 0.000000e+00 : f32
    %78 = vector.broadcast %cst_16 : f32 to vector<1x10x1x8xf32>
    %79 = tpu.concatenate %77, %76, %77 in 1 : vector<1x1x8x8xf32>, vector<1x8x8x8xf32>, vector<1x1x8x8xf32> -> vector<1x10x8x8xf32>
    %80 = tpu.concatenate %78, %79, %78 in 2 : vector<1x10x1x8xf32>, vector<1x10x8x8xf32>, vector<1x10x1x8xf32> -> vector<1x10x10x8xf32>
    %81 = vector.extract_strided_slice %80 {offsets = [0, 0, 0, 0], sizes = [1, 8, 8, 8], strides = [1, 1, 1, 1]} : vector<1x10x10x8xf32> to vector<1x8x8x8xf32>
    %82 = vector.extract_strided_slice %80 {offsets = [0, 0, 1, 0], sizes = [1, 8, 8, 8], strides = [1, 1, 1, 1]} : vector<1x10x10x8xf32> to vector<1x8x8x8xf32>
    %83 = vector.extract_strided_slice %80 {offsets = [0, 0, 2, 0], sizes = [1, 8, 8, 8], strides = [1, 1, 1, 1]} : vector<1x10x10x8xf32> to vector<1x8x8x8xf32>
    %84 = vector.extract_strided_slice %80 {offsets = [0, 1, 0, 0], sizes = [1, 8, 8, 8], strides = [1, 1, 1, 1]} : vector<1x10x10x8xf32> to vector<1x8x8x8xf32>
    %85 = vector.extract_strided_slice %80 {offsets = [0, 1, 1, 0], sizes = [1, 8, 8, 8], strides = [1, 1, 1, 1]} : vector<1x10x10x8xf32> to vector<1x8x8x8xf32>
    %86 = vector.extract_strided_slice %80 {offsets = [0, 1, 2, 0], sizes = [1, 8, 8, 8], strides = [1, 1, 1, 1]} : vector<1x10x10x8xf32> to vector<1x8x8x8xf32>
    %87 = vector.extract_strided_slice %80 {offsets = [0, 2, 0, 0], sizes = [1, 8, 8, 8], strides = [1, 1, 1, 1]} : vector<1x10x10x8xf32> to vector<1x8x8x8xf32>
    %88 = vector.extract_strided_slice %80 {offsets = [0, 2, 1, 0], sizes = [1, 8, 8, 8], strides = [1, 1, 1, 1]} : vector<1x10x10x8xf32> to vector<1x8x8x8xf32>
    %89 = vector.extract_strided_slice %80 {offsets = [0, 2, 2, 0], sizes = [1, 8, 8, 8], strides = [1, 1, 1, 1]} : vector<1x10x10x8xf32> to vector<1x8x8x8xf32>
    %cst_17 = arith.constant 0.000000e+00 : f32
    %90 = vector.broadcast %cst_17 : f32 to vector<1x8x8x56xf32>
    %91 = tpu.concatenate %81, %82, %83, %84, %85, %86, %87, %88, %89, %90 in 3 : vector<1x8x8x8xf32>, vector<1x8x8x8xf32>, vector<1x8x8x8xf32>, vector<1x8x8x8xf32>, vector<1x8x8x8xf32>, vector<1x8x8x8xf32>, vector<1x8x8x8xf32>, vector<1x8x8x8xf32>, vector<1x8x8x8xf32>, vector<1x8x8x56xf32> -> vector<1x8x8x128xf32>
    %92 = vector.shape_cast %91 : vector<1x8x8x128xf32> to vector<64x128xf32>
    %c0_18 = arith.constant 0 : index
    %c0_19 = arith.constant 0 : index
    %93 = vector.load %arg4[%c0_18, %c0_19] : memref<128x8xbf16, #tpu.memory_space<vmem>>, vector<128x8xbf16>
    %94 = arith.truncf %92 : vector<64x128xf32> to vector<64x128xbf16>
    %cst_20 = arith.constant dense<0.000000e+00> : vector<64x8xf32>
    %95 = tpu.matmul %94, %93, %cst_20 {dimension_numbers = #tpu.dot_dimension_numbers<[1], [0], [0], [1], [0, 0, 1, 1], [], []>} : vector<64x128xbf16>, vector<128x8xbf16>, vector<64x8xf32> -> vector<64x8xf32>
    %96 = vector.shape_cast %95 : vector<64x8xf32> to vector<1x8x8x8xf32>
    %97 = vector.shape_cast %10 : vector<8xf32> to vector<1x1x1x8xf32>
    %98 = vector.broadcast %97 : vector<1x1x1x8xf32> to vector<1x8x8x8xf32>
    %99 = arith.mulf %96, %98 : vector<1x8x8x8xf32>
    %100 = vector.shape_cast %12 : vector<8xf32> to vector<1x1x1x8xf32>
    %101 = vector.broadcast %100 : vector<1x1x1x8xf32> to vector<1x8x8x8xf32>
    %102 = arith.addf %99, %101 : vector<1x8x8x8xf32>
    %103 = arith.addf %102, %48 : vector<1x8x8x8xf32>
    %cst_21 = arith.constant 0.000000e+00 : f32
    %104 = vector.broadcast %cst_21 : f32 to vector<1x8x8x8xf32>
    %105 = arith.maximumf %103, %104 : vector<1x8x8x8xf32>
    %106 = arith.addf %105, %48 : vector<1x8x8x8xf32>
    %c0_22 = arith.constant 0 : index
    %c0_23 = arith.constant 0 : index
    %c0_24 = arith.constant 0 : index
    %c0_25 = arith.constant 0 : index
    %107 = vector.load %arg6[%c0_22, %c0_23, %c0_24, %c0_25] : memref<1x8x8x8xf32, #tpu.memory_space<vmem>>, vector<1x8x8x8xf32>
    tpu.vector_store %arg6[%c0_22, %c0_23, %c0_24, %c0_25], %106 {strides = array<i32>} : memref<1x8x8x8xf32, #tpu.memory_space<vmem>>, vector<1x8x8x8xf32>,
    return
  }
  func.func @transform_0(%arg0: i32) -> (i32, i32, i32, i32) {
    %c0_i32 = arith.constant 0 : i32
    %c0_i32_0 = arith.constant 0 : i32
    %c0_i32_1 = arith.constant 0 : i32
    %c0_i32_2 = arith.constant 0 : i32
    return %arg0, %c0_i32, %c0_i32_0, %c0_i32_1 : i32, i32, i32, i32
  }
  func.func @transform_1(%arg0: i32) -> (i32, i32) {
    %c0_i32 = arith.constant 0 : i32
    %c0_i32_0 = arith.constant 0 : i32
    %c0_i32_1 = arith.constant 0 : i32
    return %c0_i32, %c0_i32_0 : i32, i32
  }
  func.func @transform_2(%arg0: i32) -> (i32, i32) {
    %c0_i32 = arith.constant 0 : i32
    %c0_i32_0 = arith.constant 0 : i32
    %c0_i32_1 = arith.constant 0 : i32
    return %c0_i32, %c0_i32_0 : i32, i32
  }
  func.func @transform_3(%arg0: i32) -> (i32, i32) {
    %c0_i32 = arith.constant 0 : i32
    %c0_i32_0 = arith.constant 0 : i32
    %c0_i32_1 = arith.constant 0 : i32
    return %c0_i32, %c0_i32_0 : i32, i32
  }
  func.func @transform_4(%arg0: i32) -> (i32, i32) {
    %c0_i32 = arith.constant 0 : i32
    %c0_i32_0 = arith.constant 0 : i32
    %c0_i32_1 = arith.constant 0 : i32
    return %c0_i32, %c0_i32_0 : i32, i32
  }
  func.func @transform_5(%arg0: i32) -> (i32, i32, i32, i32) {
    %c0_i32 = arith.constant 0 : i32
    %c0_i32_0 = arith.constant 0 : i32
    %c0_i32_1 = arith.constant 0 : i32
    %c0_i32_2 = arith.constant 0 : i32
    return %arg0, %c0_i32, %c0_i32_0, %c0_i32_1 : i32, i32, i32, i32
  }
}

</mosaic_0001>

<bundles_post_ra>
// kernel: base_layer_forward.1
= control target key start
LH: loop header
LB: loop body
LE: loop exit
PB: predicated region body
PF: predicated region fallthrough
CT: control target
= control target key end

     0   :  { %s2750_s18 = smov 0   ;;  %s3822_s0 = inlined_call_operand.vmem [shape: f32[2,18,9,8], index: 0, kind: input, shape index: {}]   ;;  %s3823_s1 = inlined_call_operand.vmem [shape: bf16[48,16], index: 1, kind: input, shape index: {}]   ;;  %s3824_s2 = inlined_call_operand.vmem [shape: bf16[128,8], index: 2, kind: input, shape index: {}]   ;;  %s3825_s3 = inlined_call_operand.vmem [shape: bf16[128,8], index: 3, kind: input, shape index: {}]   ;;  %s3826_s4 = inlined_call_operand.vmem [shape: f32[6,8], index: 4, kind: input, shape index: {}]   ;;  %s3827_s5 = inlined_call_operand.vmem [shape: f32[2,8,8,8], index: 5, kind: output, shape index: {}]  }
   0x1 LB: > { %s2046_s19 = sadd.s32 4294967295, %s2708_s18   ;;  %p2050_p0 = scmp.ge.s32.totalorder %s2708_s18, 1  ;;  %s2708_s18 = sphi %s2750_s18, %s15_s18  }
   0x2   : > { %p187_p1 = scmp.lt.s32.totalorder %s2708_s18, 3 }
   0x4   : > { %p188_p2 = pnand %p2050_p0, %p187_p1 }
   0x5   : > { %p215_p3 = scmp.lt.s32.totalorder (!%p188_p2), %s2046_s19, 1  ;;  %s2710_s24 = smov (!%p188_p2), 32  }
   0x6   : > { %191 = sbr.rel (%p188_p2) target bundleno = 1116 (0x45c), region = 40  ;;  %s2711_s25 = smov (!%p188_p2), 16  }
   0x7   : > { %s2712_s26 = smov (!%p188_p2), 40   ;;  %s2713_s27 = smov (!%p188_p2), 24  }
   0x8   : > { %s2714_s28 = smov (!%p188_p2), 8   ;;  %s2715_s10 = smov (!%p188_p2), 120  }
   0x9   : > { %s2717_s13 = smov (!%p188_p2), 48   ;;  %s2718_s14 = smov (!%p188_p2), 56  }
   0xa   : > { %s2719_s15 = smov (!%p188_p2), 64  }
   0xb   : > { %s3831_s19 = smov (!%p215_p3, %s2046_s19), 1  ;;  %vm295_vm0 = vcmask 1046528   ;;  %vm594_vm1 = vcmask 64512   ;;  %vm611_vm2 = vcmask 97280   ;;  %vm628_vm3 = vcmask 130048  }
   0xc   : > { %s2187_s20 = smul.u32 288, %s3831_s19  ;;  %vm645_vm4 = vcmask 162816   ;;  %vm662_vm5 = vcmask 195584   ;;  %vm679_vm6 = vcmask 228352   ;;  %vm696_vm7 = vcmask 261120   ;;  %s2164_s9 = sshll.u32 %s3831_s19, 6 }
   0xd   : > { %vm713_vm8 = vcmask 293888   ;;  %vm730_vm9 = vcmask 326656   ;;  %vm747_vm10 = vcmask 359424   ;;  %vm796_vm11 = vcmask 392192   ;;  %s3786_s12 = scalar_lea.vmem %s3827_s5, %s2164_s9 }
   0xe   : > { %s2764_s23 = scalar_lea.vmem %s3822_s0, %s2187_s20  ;;  %vm1011_vm12 = vcmask 1040384   ;;  %vm1094_vm13 = vcmask 1045504   ;;  %vm1343_vm14 = vcmask 457728   ;;  %vm1352_vm15 = vcmask 523264  }
   0xf   : > { %v2767_v0 = vld [vmem:[%s2764_s23 + $0x20] sm:$0xff]  ;;  %v2770_v1 = vld [vmem:[%s2764_s23 + $0x30] sm:$0xff]  ;;  %v230_v7 = vld [vmem:[%s2764_s23 + $0x18] sm:$0x1] }
  0x10   : > { %v2773_v2 = vld [vmem:[%s2764_s23 + $0x10] sm:$0xff]  ;;  %v305_v3 = vrot.slane %v2770_v1, 1  ;;  %v2211_v4 = vpack.i.bf16 %v2770_v1, %v2767_v0  ;;  %v302_v5 = vrot.slane %v2767_v0, 1  ;;  %v232_v8 = vld [vmem:[%s2764_s23 + $0x28] sm:$0x1]  ;;  %v300_v10 = vrot.slane %v230_v7, 1 }
  0x11   : > { %v2206_v6 = vpack.i.bf16 %v2767_v0, %v2773_v2  ;;  %v299_v9 = vrot.slane %v2773_v2, 1  ;;  %v303_v11 = vrot.slane %v232_v8, 1  ;;  %v2785_v12 = vld [vmem:[%s2764_s23] sm:$0xff]  ;;  %v228_v13 = vld [vmem:[%s2764_s23 + $0x8] sm:$0x1]  ;;  %v2806_v30 = vld [vmem:[%s2764_s23 + $0x50] sm:$0xff] }
  0x12   : > { %2212 = vrot.lane.b32.xlu1 %v2211_v4, %s2710_s24  ;;  %v296_v14 = vrot.slane %v2785_v12, 1  ;;  %v297_v15 = vrot.slane %v228_v13, 1  ;;  %v234_v16 = vld [vmem:[%s2764_s23 + $0x38] sm:$0x1]  ;;  %v2796_v21 = vld [vmem:[%s2764_s23 + $0x40] sm:$0xff]  ;;  %v311_v34 = vrot.slane %v2806_v30, 1 }
  0x13   : > { %2207 = vrot.lane.b32.xlu0 %v2206_v6, %s2711_s25  ;;  %v301_v17 = vsel %vm295_vm0, %v299_v9, %v300_v10  ;;  %v304_v18 = vsel %vm295_vm0, %v302_v5, %v303_v11  ;;  %v306_v19 = vrot.slane %v234_v16, 1  ;;  %v236_v22 = vld [vmem:[%s2764_s23 + $0x48] sm:$0x1]  ;;  %v308_v27 = vrot.slane %v2796_v21, 1  ;;  %v238_v31 = vld [vmem:[%s2764_s23 + $0x58] sm:$0x1] }
  0x14   : > { %v298_v20 = vsel %vm295_vm0, %v296_v14, %v297_v15  ;;  %v2226_v24 = vpack.i.bf16 %v304_v18, %v301_v17  ;;  %v309_v28 = vrot.slane %v236_v22, 1  ;;  %v2221_v33 = vpack.i.bf16 %v2796_v21, %v2770_v1  ;;  %v2817_v37 = vld [vmem:[%s2764_s23 + $0x60] sm:$0xff]  ;;  %v240_v38 = vld [vmem:[%s2764_s23 + $0x68] sm:$0x1]  ;;  %v2827_v43 = vld [vmem:[%s2764_s23 + $0x70] sm:$0xff] }
  0x15   : > { %v307_v23 = vsel %vm295_vm0, %v305_v3, %v306_v19  ;;  %v2216_v25 = vpack.i.bf16 %v301_v17, %v298_v20  ;;  %v312_v35 = vrot.slane %v238_v31, 1  ;;  %v2246_v39 = vpack.i.bf16 %v2806_v30, %v2796_v21  ;;  %v242_v45 = vld [vmem:[%s2764_s23 + $0x78] sm:$0x1]  ;;  %v2840_v51 = vld [vmem:[%s2764_s23 + $0x80] sm:$0xff]  ;;  %v248_v54 = vld [vmem:[%s2764_s23 + $0xa8] sm:$0x1] }
  0x16   : > { %v2231_v26 = vpack.i.bf16 %v307_v23, %v304_v18  ;;  %v310_v29 = vsel %vm295_vm0, %v308_v27, %v309_v28  ;;  %v314_v41 = vrot.slane %v2817_v37, 1  ;;  %v315_v42 = vrot.slane %v240_v38, 1  ;;  %v2844_v53 = vld [vmem:[%s2764_s23 + $0xa0] sm:$0xff]  ;;  %v2848_v55 = vld [vmem:[%s2764_s23 + $0xb0] sm:$0xff]  ;;  %v250_v56 = vld [vmem:[%s2764_s23 + $0xb8] sm:$0x1] }
  0x17   : > { %v2241_v32 = vpack.i.bf16 %v310_v29, %v307_v23  ;;  %v313_v36 = vsel %vm295_vm0, %v311_v34, %v312_v35  ;;  %v2261_v46 = vpack.i.bf16 %v2817_v37, %v2806_v30  ;;  %v2271_v47 = vpack.i.bf16 %v2827_v43, %v2817_v37  ;;  %v244_v58 = vld [vmem:[%s2764_s23 + $0x88] sm:$0x1]  ;;  %v2863_v7 = vld [vmem:[%s2764_s23 + $0x90] sm:$0xff]  ;;  %v2867_v9 = vld [vmem:[%s2764_s23 + $0xc0] sm:$0xff] }
  0x18   : > { %2232 = vrot.lane.b32.xlu2 %v2231_v26, %s2712_s26  ;;  %v2256_v40 = vpack.i.bf16 %v313_v36, %v310_v29  ;;  %v316_v44 = vsel %vm295_vm0, %v314_v41, %v315_v42  ;;  %v317_v49 = vrot.slane %v2827_v43, 1  ;;  %v318_v50 = vrot.slane %v242_v45, 1  ;;  %v252_v10 = vld [vmem:[%s2764_s23 + $0xc8] sm:$0x1]  ;;  %v246_v11 = vld [vmem:[%s2764_s23 + $0x98] sm:$0x1] }
  0x19   : > { %v2266_v48 = vpack.i.bf16 %v316_v44, %v313_v36  ;;  %v2286_v59 = vpack.i.bf16 %v2840_v51, %v2827_v43  ;;  %v326_v60 = vrot.slane %v2844_v53, 1  ;;  %v327_v61 = vrot.slane %v248_v54, 1  ;;  %v2881_v23 = vld [vmem:[%s2764_s23 + $0xd0] sm:$0xff]  ;;  %v2904_v38 = vld [vmem:[%s2764_s23 + $0xe0] sm:$0xff]  ;;  %v258_v41 = vld [vmem:[%s2764_s23 + $0xf8] sm:$0x1] }
  0x1a   : > { %2227 = vrot.lane.b32.xlu1 %v2226_v24, %s2713_s27  ;;  %v319_v52 = vsel %vm295_vm0, %v317_v49, %v318_v50  ;;  %v329_v62 = vrot.slane %v2848_v55, 1  ;;  %v330_v63 = vrot.slane %v250_v56, 1  ;;  %v320_v3 = vrot.slane %v2840_v51, 1  ;;  %v254_v24 = vld [vmem:[%s2764_s23 + $0xd8] sm:$0x1]  ;;  %v259_v50 = vld [vmem:[%s2764_s23 + $0x100] sm:$0xff] }
  0x1b   : > { %2217 = vrot.lane.b32.xlu0 %v2216_v25, %s2714_s28  ;;  %v2276_v57 = vpack.i.bf16 %v319_v52, %v316_v44  ;;  %v321_v4 = vrot.slane %v244_v58, 1  ;;  %v328_v5 = vsel %vm295_vm0, %v326_v60, %v327_v61  ;;  %v2296_v15 = vpack.i.bf16 %v2863_v7, %v2840_v51  ;;  %v261_v61 = vld [vmem:[%s2764_s23 + $0x110] sm:$0xff] }
  0x1c   : > { %v331_v6 = vsel %vm295_vm0, %v329_v62, %v330_v63  ;;  %v332_v16 = vrot.slane %v2867_v9, 1  ;;  %v333_v17 = vrot.slane %v252_v10, 1  ;;  %v323_v18 = vrot.slane %v2863_v7, 1  ;;  %v262_v62 = vld [vmem:[%s2764_s23 + $0x118] sm:$0x1]  ;;  %v2166_v10 = vld [vmem:[%s3823_s1 + $0x8] sm:$0xff] }
  0x1d   : > { %v322_v8 = vsel %vm295_vm0, %v320_v3, %v321_v4  ;;  %v2301_v14 = vpack.i.bf16 %v331_v6, %v328_v5  ;;  %v324_v19 = vrot.slane %v246_v11, 1  ;;  %v2311_v27 = vpack.i.bf16 %v2867_v9, %v2848_v55  ;;  %v2167_v4 = vld [vmem:[%s3823_s1 + $0x10] sm:$0xff] }
  0x1e   : > { %v2291_v13 = vpack.i.bf16 %v322_v8, %v319_v52  ;;  %v334_v20 = vsel %vm295_vm0, %v332_v16, %v333_v17  ;;  %v335_v28 = vrot.slane %v2881_v23, 1  ;;  %v336_v29 = vrot.slane %v254_v24, 1  ;;  %v260_v52 = vld [vmem:[%s2764_s23 + $0x108] sm:$0x1]  ;;  %826 = vmatpush.bf16.msra.mxu0 %v2167_v4  ;;  %2184 = vmatpush.bf16.msra.mxu3 %v2167_v4 }
  0x1f   : > { %v325_v22 = vsel %vm295_vm0, %v323_v18, %v324_v19  ;;  %v2336_v34 = vpack.i.bf16 %v2844_v53, %v2863_v7  ;;  %v2346_v35 = vpack.i.bf16 %v2848_v55, %v2844_v53  ;;  %v2361_v42 = vpack.i.bf16 %v2904_v38, %v2881_v23 }
  0x20   : > { %2237 = vrot.lane.b32.xlu2 %v2231_v26, %s2714_s28  ;;  %v2306_v25 = vpack.i.bf16 %v325_v22, %v322_v8  ;;  %v2316_v26 = vpack.i.bf16 %v334_v20, %v331_v6  ;;  %v337_v31 = vsel %vm295_vm0, %v335_v28, %v336_v29  ;;  %v2341_v36 = vpack.i.bf16 %v328_v5, %v325_v22 }
  0x21   : > { %v338_v44 = vrot.slane %v2904_v38, 1  ;;  %v442_v58 = vrot.slane %v259_v50, 1  ;;  %v543_v5 = vrot.slane %v261_v61, 1  ;;  %v544_v6 = vrot.slane %v262_v62, 1 }
  0x22   : > { %2242 = vrot.lane.b32.xlu1 %v2241_v32, %s2713_s27  ;;  %v2321_v32 = vpack.i.bf16 %v2881_v23, %v2867_v9  ;;  %827 = vmatpush.bf16.msra.mxu0 %v2166_v10 }
  0x23   : > { %2222 = vrot.lane.b32.xlu0 %v2221_v33, %s2711_s25  ;;  %v2326_v33 = vpack.i.bf16 %v337_v31, %v334_v20  ;;  %v545_v11 = vsel %vm295_vm0, %v543_v5, %v544_v6  ;;  %2185 = vmatpush.bf16.msra.mxu3 %v2166_v10 }
  0x28   : > { %2247 = vrot.lane.b32.xlu2 %v2246_v39, %s2710_s24  ;;  %v2907_v39 = vld [vmem:[%s2764_s23 + $0xf0] sm:$0xff] }
  0x29   : > { %v2371_v56 = vpack.i.bf16 %v2907_v39, %v2904_v38  ;;  %v2386_v63 = vpack.i.bf16 %v259_v50, %v2907_v39 }
  0x2a   : > { %2257 = vrot.lane.b32.xlu1 %v2256_v40, %s2714_s28 }
  0x2b   : > { %2252 = vrot.lane.b32.xlu0 %v2256_v40, %s2712_s26  ;;  %v256_v40 = vld [vmem:[%s2764_s23 + $0xe8] sm:$0x1] }
  0x2c   : > { %v339_v45 = vrot.slane %v256_v40, 1 }
  0x30   : > { %2262 = vrot.lane.b32.xlu2 %v2261_v46, %s2711_s25  ;;  %v341_v46 = vrot.slane %v2907_v39, 1 }
  0x32   : > { %2272 = vrot.lane.b32.xlu1 %v2271_v47, %s2710_s24  ;;  %v342_v47 = vrot.slane %v258_v41, 1 }
  0x33   : > { %2267 = vrot.lane.b32.xlu0 %v2266_v48, %s2713_s27  ;;  %v340_v48 = vsel %vm295_vm0, %v338_v44, %v339_v45 }
  0x34   : > { %v343_v49 = vsel %vm295_vm0, %v341_v46, %v342_v47  ;;  %v2366_v54 = vpack.i.bf16 %v340_v48, %v337_v31 }
  0x38   : > { %2277 = vrot.lane.b32.xlu2 %v2276_v57, %s2712_s26 }
  0x3a   : > { %2287 = vrot.lane.b32.xlu1 %v2286_v59, %s2711_s25  ;;  %v443_v59 = vrot.slane %v260_v52, 1 }
  0x3b   : > { %2282 = vrot.lane.b32.xlu0 %v2276_v57, %s2714_s28  ;;  %v2376_v57 = vpack.i.bf16 %v343_v49, %v340_v48 }
  0x3c   : > { %v444_v60 = vsel %vm295_vm0, %v442_v58, %v443_v59 }
  0x3d   : > { %v2391_v3 = vpack.i.bf16 %v444_v60, %v343_v49 }
  0x40   : > { %2292 = vrot.lane.b32.xlu2 %v2291_v13, %s2713_s27  ;;  %v2396_v13 = vpack.i.bf16 %v261_v61, %v259_v50 }
  0x42   : > { %2302 = vrot.lane.b32.xlu1 %v2301_v14, %s2714_s28 }
  0x43   : > { %2297 = vrot.lane.b32.xlu0 %v2296_v15, %s2710_s24  ;;  %v2165_v15 = vld [vmem:[%s3823_s1] sm:$0xff] }
  0x44   : > { %828 = vmatpush.bf16.msra.mxu0 %v2165_v15  ;;  %2186 = vmatpush.bf16.msra.mxu3 %v2165_v15 }
  0x48   : > { %2307 = vrot.lane.b32.xlu2 %v2306_v25, %s2712_s26 }
  0x4a   : > { %2317 = vrot.lane.b32.xlu1 %v2316_v26, %s2713_s27 }
  0x4b   : > { %2312 = vrot.lane.b32.xlu0 %v2311_v27, %s2711_s25 }
  0x50   : > { %2322 = vrot.lane.b32.xlu2 %v2321_v32, %s2710_s24 }
  0x52   : > { %2332 = vrot.lane.b32.xlu1 %v2306_v25, %s2714_s28 }
  0x53   : > { %2327 = vrot.lane.b32.xlu0 %v2326_v33, %s2712_s26 }
  0x58   : > { %2337 = vrot.lane.b32.xlu2 %v2336_v34, %s2711_s25 }
  0x5a   : > { %2347 = vrot.lane.b32.xlu1 %v2346_v35, %s2710_s24 }
  0x5b   : > { %2342 = vrot.lane.b32.xlu0 %v2341_v36, %s2713_s27 }
  0x60   : > { %2352 = vrot.lane.b32.xlu2 %v2326_v33, %s2714_s28 }
  0x62   : > { %2362 = vrot.lane.b32.xlu1 %v2361_v42, %s2711_s25 }
  0x63   : > { %2357 = vrot.lane.b32.xlu0 %v2301_v14, %s2712_s26  ;;  %v2401_v14 = vpack.i.bf16 %v545_v11, %v444_v60 }
  0x68   : > { %2367 = vrot.lane.b32.xlu2 %v2366_v54, %s2713_s27 }
  0x6a   : > { %2377 = vrot.lane.b32.xlu1 %v2376_v57, %s2712_s26 }
  0x6b   : > { %2372 = vrot.lane.b32.xlu0 %v2371_v56, %s2710_s24 }
  0x70   : > { %2382 = vrot.lane.b32.xlu2 %v2376_v57, %s2714_s28 }
  0x72   : > { %2392 = vrot.lane.b32.xlu1 %v2391_v3, %s2713_s27  ;;  %v2937_v8 = vpop.permute.xlu2 %2232 }
  0x73   : > { %2387 = vrot.lane.b32.xlu0 %v2386_v63, %s2711_s25  ;;  %v2235_v29 = vunpack.i.h.bf16 %v2937_v8  ;;  %v2234_v31 = vunpack.i.l.bf16 %v2937_v8 }
  0x78   : > { %2397 = vrot.lane.b32.xlu2 %v2396_v13, %s2710_s24 }
  0x7a   : > { %v2238_v16 = vpop.permute.xlu2 %2237 }
  0x7b   : > { %2402 = vrot.lane.b32.xlu0 %v2401_v14, %s2712_s26  ;;  %v2240_v25 = vunpack.i.h.bf16 %v2238_v16  ;;  %v2239_v26 = vunpack.i.l.bf16 %v2238_v16 }
  0x7d   : > { %v598_v41 = vsel %vm594_vm1, %v2770_v1, %v2240_v25  ;;  %v597_v42 = vsel %vm594_vm1, %v2767_v0, %v2239_v26 }
  0x7e   : > { %v615_v1 = vsel %vm611_vm2, %v598_v41, %v2240_v25  ;;  %v614_v0 = vsel %vm611_vm2, %v597_v42, %v2239_v26 }
  0x82   : > { %v2948_v17 = vpop.permute.xlu2 %2247 }
  0x83   : > { %v2250_v25 = vunpack.i.h.bf16 %v2948_v17  ;;  %v2249_v26 = vunpack.i.l.bf16 %v2948_v17 }
  0x84   : > { %v2213_v18 = vpop.permute.xlu1 %2212 }
  0x85   : > { %v2208_v19 = vpop.permute.xlu0 %2207  ;;  %v2215_v50 = vunpack.i.h.bf16 %v2213_v18  ;;  %v2214_v52 = vunpack.i.l.bf16 %v2213_v18 }
  0x86   : > { %v2210_v32 = vunpack.i.h.bf16 %v2208_v19  ;;  %v2209_v33 = vunpack.i.l.bf16 %v2208_v19 }
  0x8a   : > { %v2950_v20 = vpop.permute.xlu2 %2262 }
  0x8b   : > { %v2264_v17 = vunpack.i.l.bf16 %v2950_v20 }
  0x8c   : > { %v2228_v22 = vpop.permute.xlu1 %2227 }
  0x8d   : > { %v2218_v24 = vpop.permute.xlu0 %2217  ;;  %v2230_v44 = vunpack.i.h.bf16 %v2228_v22  ;;  %v2229_v45 = vunpack.i.l.bf16 %v2228_v22 }
  0x8e   : > { %v2220_v27 = vunpack.i.h.bf16 %v2218_v24  ;;  %v2219_v28 = vunpack.i.l.bf16 %v2218_v24 }
  0x90   : > { %v596_v34 = vsel %vm594_vm1, %v2773_v2, %v2220_v27  ;;  %v595_v35 = vsel %vm594_vm1, %v2785_v12, %v2219_v28 }
  0x91   : > { %v613_v36 = vsel %vm611_vm2, %v596_v34, %v2220_v27  ;;  %v612_v40 = vsel %vm611_vm2, %v595_v35, %v2219_v28 }
  0x92   : > { %v630_v46 = vsel %vm628_vm3, %v613_v36, %v2210_v32  ;;  %v629_v47 = vsel %vm628_vm3, %v612_v40, %v2209_v33  ;;  %v2974_v61 = vpop.permute.xlu2 %2277  ;;  %v2265_v36 = vunpack.i.h.bf16 %v2950_v20 }
  0x93   : > { %v647_v2 = vsel %vm645_vm4, %v630_v46, %v2210_v32  ;;  %v646_v12 = vsel %vm645_vm4, %v629_v47, %v2209_v33 }
  0x94   : > { %v664_v48 = vsel %vm662_vm5, %v647_v2, %v2230_v44  ;;  %v663_v49 = vsel %vm662_vm5, %v646_v12, %v2229_v45  ;;  %v2243_v54 = vpop.permute.xlu1 %2242 }
  0x95   : > { %v2223_v56 = vpop.permute.xlu0 %2222  ;;  %v680_v57 = vsel %vm679_vm6, %v663_v49, %v2229_v45  ;;  %v681_v58 = vsel %vm679_vm6, %v664_v48, %v2230_v44  ;;  %v2245_v62 = vunpack.i.h.bf16 %v2243_v54  ;;  %v2244_v63 = vunpack.i.l.bf16 %v2243_v54 }
  0x96   : > { %v2225_v59 = vunpack.i.h.bf16 %v2223_v56  ;;  %v2224_v60 = vunpack.i.l.bf16 %v2223_v56  ;;  %v697_v3 = vsel %vm696_vm7, %v680_v57, %v2214_v52  ;;  %v698_v4 = vsel %vm696_vm7, %v681_v58, %v2215_v50 }
  0x97   : > { %v714_v8 = vsel %vm713_vm8, %v697_v3, %v2214_v52  ;;  %v715_v10 = vsel %vm713_vm8, %v698_v4, %v2215_v50 }
  0x98   : > { %v632_v5 = vsel %vm628_vm3, %v615_v1, %v2225_v59  ;;  %v631_v6 = vsel %vm628_vm3, %v614_v0, %v2224_v60  ;;  %v731_v14 = vsel %vm730_vm9, %v714_v8, %v2234_v31  ;;  %v732_v15 = vsel %vm730_vm9, %v715_v10, %v2235_v29 }
  0x99   : > { %v649_v11 = vsel %vm645_vm4, %v632_v5, %v2225_v59  ;;  %v648_v13 = vsel %vm645_vm4, %v631_v6, %v2224_v60  ;;  %v748_v16 = vsel %vm747_vm10, %v731_v14, %v2234_v31  ;;  %v749_v18 = vsel %vm747_vm10, %v732_v15, %v2235_v29 }
  0x9a   : > { %v666_v19 = vsel %vm662_vm5, %v649_v11, %v2245_v62  ;;  %v665_v22 = vsel %vm662_vm5, %v648_v13, %v2244_v63  ;;  %v770_v24 = vpack.c.bf16 %v749_v18, %v748_v16  ;;  %v3001_v40 = vpop.permute.xlu2 %2292 }
  0x9b   : > { %v682_v32 = vsel %vm679_vm6, %v665_v22, %v2244_v63  ;;  %v683_v31 = vsel %vm679_vm6, %v666_v19, %v2245_v62  ;;  %v2280_v22 = vunpack.i.h.bf16 %v2974_v61 }
  0x9c   : > { %2066 = vmatmul.msk.bf16.vlgmr.msra.gmra.mxu0 %vm796_vm11, %v770_v24  ;;  %v2258_v27 = vpop.permute.xlu1 %2257  ;;  %v699_v41 = vsel %vm696_vm7, %v682_v32, %v2249_v26  ;;  %v700_v42 = vsel %vm696_vm7, %v683_v31, %v2250_v25  ;;  %v2279_v24 = vunpack.i.l.bf16 %v2974_v61  ;;  %v2295_v61 = vunpack.i.h.bf16 %v3001_v40 }
  0x9d   : > { %v2253_v28 = vpop.permute.xlu0 %2252  ;;  %v2260_v33 = vunpack.i.h.bf16 %v2258_v27  ;;  %v2259_v29 = vunpack.i.l.bf16 %v2258_v27 }
  0x9e   : > { %v2255_v44 = vunpack.i.h.bf16 %v2253_v28  ;;  %v2254_v45 = vunpack.i.l.bf16 %v2253_v28 }
  0x9f   : > { %v600_v34 = vsel %vm594_vm1, %v2806_v30, %v2260_v33  ;;  %v599_v35 = vsel %vm594_vm1, %v2796_v21, %v2259_v29  ;;  %v716_v30 = vsel %vm713_vm8, %v699_v41, %v2249_v26  ;;  %v717_v21 = vsel %vm713_vm8, %v700_v42, %v2250_v25 }
  0xa0   : > { %v617_v46 = vsel %vm611_vm2, %v600_v34, %v2260_v33  ;;  %v616_v47 = vsel %vm611_vm2, %v599_v35, %v2259_v29  ;;  %v733_v2 = vsel %vm730_vm9, %v716_v30, %v2254_v45  ;;  %v734_v20 = vsel %vm730_vm9, %v717_v21, %v2255_v44 }
  0xa1   : > { %v633_v12 = vsel %vm628_vm3, %v616_v47, %v2264_v17  ;;  %v634_v48 = vsel %vm628_vm3, %v617_v46, %v2265_v36  ;;  %v750_v56 = vsel %vm747_vm10, %v733_v2, %v2254_v45  ;;  %v751_v57 = vsel %vm747_vm10, %v734_v20, %v2255_v44 }
  0xa2   : > { %v650_v52 = vsel %vm645_vm4, %v633_v12, %v2264_v17  ;;  %v651_v54 = vsel %vm645_vm4, %v634_v48, %v2265_v36  ;;  %v3019_v60 = vpop.permute.xlu2 %2307  ;;  %v771_v3 = vpack.c.bf16 %v751_v57, %v750_v56  ;;  %v2294_v29 = vunpack.i.l.bf16 %v3001_v40 }
  0xa4   : > { %v2273_v49 = vpop.permute.xlu1 %2272 }
  0xa5   : > { %v2268_v1 = vpop.permute.xlu0 %2267  ;;  %v2275_v62 = vunpack.i.h.bf16 %v2273_v49  ;;  %v2274_v63 = vunpack.i.l.bf16 %v2273_v49 }
  0xa6   : > { %v2270_v0 = vunpack.i.h.bf16 %v2268_v1  ;;  %v2269_v50 = vunpack.i.l.bf16 %v2268_v1 }
  0xa8   : > { %v668_v58 = vsel %vm662_vm5, %v651_v54, %v2270_v0  ;;  %v667_v59 = vsel %vm662_vm5, %v650_v52, %v2269_v50 }
  0xa9   : > { %v685_v4 = vsel %vm679_vm6, %v668_v58, %v2270_v0  ;;  %v684_v5 = vsel %vm679_vm6, %v667_v59, %v2269_v50 }
  0xaa   : > { %v702_v13 = vsel %vm696_vm7, %v685_v4, %v2275_v62  ;;  %v701_v14 = vsel %vm696_vm7, %v684_v5, %v2274_v63 }
  0xab   : > { %v718_v27 = vsel %vm713_vm8, %v701_v14, %v2274_v63  ;;  %v719_v28 = vsel %vm713_vm8, %v702_v13, %v2275_v62  ;;  %v2310_v62 = vunpack.i.h.bf16 %v3019_v60 }
  0xac   : > { %2067 = vmatmul.msk.bf16.gmra.mxu0 %vm796_vm11, %v771_v3  ;;  %v2288_v6 = vpop.permute.xlu1 %2287  ;;  %v736_v33 = vsel %vm730_vm9, %v719_v28, %v2280_v22 }
  0xad   : > { %v2283_v8 = vpop.permute.xlu0 %2282  ;;  %v2290_v15 = vunpack.i.h.bf16 %v2288_v6  ;;  %v2289_v16 = vunpack.i.l.bf16 %v2288_v6  ;;  %v753_v45 = vsel %vm747_vm10, %v736_v33, %v2280_v22 }
  0xae   : > { %v2285_v10 = vunpack.i.h.bf16 %v2283_v8  ;;  %v2284_v11 = vunpack.i.l.bf16 %v2283_v8 }
  0xb0   : > { %v602_v18 = vsel %vm594_vm1, %v2827_v43, %v2285_v10  ;;  %v601_v19 = vsel %vm594_vm1, %v2817_v37, %v2284_v11  ;;  %v3038_v43 = vpop.permute.xlu2 %2322  ;;  %v735_v37 = vsel %vm730_vm9, %v718_v27, %v2279_v24 }
  0xb1   : > { %v619_v25 = vsel %vm611_vm2, %v602_v18, %v2285_v10  ;;  %v618_v26 = vsel %vm611_vm2, %v601_v19, %v2284_v11  ;;  %v752_v44 = vsel %vm747_vm10, %v735_v37, %v2279_v24  ;;  %v2325_v4 = vunpack.i.h.bf16 %v3038_v43 }
  0xb2   : > { %v636_v32 = vsel %vm628_vm3, %v619_v25, %v2290_v15  ;;  %v635_v31 = vsel %vm628_vm3, %v618_v26, %v2289_v16  ;;  %v772_v2 = vpack.c.bf16 %v753_v45, %v752_v44  ;;  %v2324_v5 = vunpack.i.l.bf16 %v3038_v43 }
  0xb3   : > { %v652_v36 = vsel %vm645_vm4, %v635_v31, %v2289_v16  ;;  %v653_v17 = vsel %vm645_vm4, %v636_v32, %v2290_v15 }
  0xb4   : > { %v2303_v34 = vpop.permute.xlu1 %2302  ;;  %v669_v46 = vsel %vm662_vm5, %v652_v36, %v2294_v29  ;;  %v670_v47 = vsel %vm662_vm5, %v653_v17, %v2295_v61 }
  0xb5   : > { %v2298_v35 = vpop.permute.xlu0 %2297  ;;  %v2305_v41 = vunpack.i.h.bf16 %v2303_v34  ;;  %v2304_v42 = vunpack.i.l.bf16 %v2303_v34  ;;  %v686_v40 = vsel %vm679_vm6, %v669_v46, %v2294_v29  ;;  %v687_v20 = vsel %vm679_vm6, %v670_v47, %v2295_v61 }
  0xb6   : > { %v2300_v30 = vunpack.i.h.bf16 %v2298_v35  ;;  %v2299_v21 = vunpack.i.l.bf16 %v2298_v35 }
  0xb7   : > { %v606_v12 = vsel %vm594_vm1, %v2848_v55, %v2305_v41  ;;  %v605_v48 = vsel %vm594_vm1, %v2844_v53, %v2304_v42  ;;  %v2309_v53 = vunpack.i.l.bf16 %v3019_v60 }
  0xb8   : > { %v703_v49 = vsel %vm696_vm7, %v686_v40, %v2299_v21  ;;  %v704_v1 = vsel %vm696_vm7, %v687_v20, %v2300_v30  ;;  %v2338_v58 = vpop.permute.xlu2 %2337  ;;  %v623_v59 = vsel %vm611_vm2, %v606_v12, %v2305_v41  ;;  %v622_v55 = vsel %vm611_vm2, %v605_v48, %v2304_v42 }
  0xb9   : > { %v720_v6 = vsel %vm713_vm8, %v703_v49, %v2299_v21  ;;  %v721_v8 = vsel %vm713_vm8, %v704_v1, %v2300_v30  ;;  %v2340_v26 = vunpack.i.h.bf16 %v2338_v58  ;;  %v2339_v27 = vunpack.i.l.bf16 %v2338_v58 }
  0xba   : > { %v737_v16 = vsel %vm730_vm9, %v720_v6, %v2309_v53  ;;  %v738_v18 = vsel %vm730_vm9, %v721_v8, %v2310_v62 }
  0xbb   : > { %v754_v61 = vsel %vm747_vm10, %v737_v16, %v2309_v53  ;;  %v755_v29 = vsel %vm747_vm10, %v738_v18, %v2310_v62 }
  0xbc   : > { %2068 = vmatmul.msk.bf16.gmra.mxu0 %vm796_vm11, %v772_v2  ;;  %v2318_v0 = vpop.permute.xlu1 %2317  ;;  %v773_v30 = vpack.c.bf16 %v755_v29, %v754_v61 }
  0xbd   : > { %v2313_v50 = vpop.permute.xlu0 %2312  ;;  %v2320_v52 = vunpack.i.h.bf16 %v2318_v0  ;;  %v2319_v54 = vunpack.i.l.bf16 %v2318_v0 }
  0xbe   : > { %v2315_v56 = vunpack.i.h.bf16 %v2313_v50  ;;  %v2314_v57 = vunpack.i.l.bf16 %v2313_v50 }
  0xc0   : > { %v640_v63 = vsel %vm628_vm3, %v623_v59, %v2315_v56  ;;  %v639_v3 = vsel %vm628_vm3, %v622_v55, %v2314_v57  ;;  %v2353_v41 = vpop.permute.xlu2 %2352 }
  0xc1   : > { %v657_v10 = vsel %vm645_vm4, %v640_v63, %v2315_v56  ;;  %v656_v11 = vsel %vm645_vm4, %v639_v3, %v2314_v57  ;;  %v2355_v12 = vunpack.i.h.bf16 %v2353_v41  ;;  %v2354_v48 = vunpack.i.l.bf16 %v2353_v41 }
  0xc2   : > { %v674_v13 = vsel %vm662_vm5, %v657_v10, %v2320_v52  ;;  %v673_v60 = vsel %vm662_vm5, %v656_v11, %v2319_v54 }
  0xc3   : > { %v690_v14 = vsel %vm679_vm6, %v673_v60, %v2319_v54  ;;  %v691_v15 = vsel %vm679_vm6, %v674_v13, %v2320_v52  ;;  %v608_v58 = vsel %vm594_vm1, %v2881_v23, %v2355_v12  ;;  %v607_v59 = vsel %vm594_vm1, %v2867_v9, %v2354_v48 }
  0xc4   : > { %v707_v19 = vsel %vm696_vm7, %v690_v14, %v2324_v5  ;;  %v708_v22 = vsel %vm696_vm7, %v691_v15, %v2325_v4  ;;  %v2333_v24 = vpop.permute.xlu1 %2332  ;;  %v625_v63 = vsel %vm611_vm2, %v608_v58, %v2355_v12  ;;  %v624_v3 = vsel %vm611_vm2, %v607_v59, %v2354_v48 }
  0xc5   : > { %v2328_v25 = vpop.permute.xlu0 %2327  ;;  %v2335_v28 = vunpack.i.h.bf16 %v2333_v24  ;;  %v2334_v32 = vunpack.i.l.bf16 %v2333_v24  ;;  %v724_v37 = vsel %vm713_vm8, %v707_v19, %v2324_v5  ;;  %v725_v33 = vsel %vm713_vm8, %v708_v22, %v2325_v4 }
  0xc6   : > { %v2330_v31 = vunpack.i.h.bf16 %v2328_v25  ;;  %v2329_v43 = vunpack.i.l.bf16 %v2328_v25 }
  0xc7   : > { %v604_v34 = vsel %vm594_vm1, %v2863_v7, %v2335_v28  ;;  %v603_v35 = vsel %vm594_vm1, %v2840_v51, %v2334_v32 }
  0xc8   : > { %v741_v36 = vsel %vm730_vm9, %v724_v37, %v2329_v43  ;;  %v742_v17 = vsel %vm730_vm9, %v725_v33, %v2330_v31  ;;  %v621_v42 = vsel %vm611_vm2, %v604_v34, %v2335_v28  ;;  %v620_v44 = vsel %vm611_vm2, %v603_v35, %v2334_v32  ;;  %v2368_v55 = vpop.permute.xlu2 %2367 }
  0xc9   : > { %v758_v45 = vsel %vm747_vm10, %v741_v36, %v2329_v43  ;;  %v759_v46 = vsel %vm747_vm10, %v742_v17, %v2330_v31  ;;  %v637_v7 = vsel %vm628_vm3, %v620_v44, %v2339_v27  ;;  %v638_v21 = vsel %vm628_vm3, %v621_v42, %v2340_v26 }
  0xca   : > { %v775_v47 = vpack.c.bf16 %v759_v46, %v758_v45  ;;  %v654_v49 = vsel %vm645_vm4, %v637_v7, %v2339_v27  ;;  %v655_v1 = vsel %vm645_vm4, %v638_v21, %v2340_v26  ;;  %v2370_v9 = vunpack.i.h.bf16 %v2368_v55 }
  0xcb   : > { %v2369_v60 = vunpack.i.l.bf16 %v2368_v55 }
  0xcc   : > { %2071 = vmatmul.msk.bf16.vlgmr.msra.gmra.mxu3 %vm796_vm11, %v775_v47  ;;  %2069 = vmatmul.msk.bf16.gmra.mxu0 %vm796_vm11, %v773_v30  ;;  %v2348_v51 = vpop.permute.xlu1 %2347 }
  0xcd   : > { %v2343_v2 = vpop.permute.xlu0 %2342  ;;  %v2350_v0 = vunpack.i.h.bf16 %v2348_v51  ;;  %v2349_v50 = vunpack.i.l.bf16 %v2348_v51 }
  0xce   : > { %v2345_v40 = vunpack.i.h.bf16 %v2343_v2  ;;  %v2344_v20 = vunpack.i.l.bf16 %v2343_v2 }
  0xd0   : > { %v672_v52 = vsel %vm662_vm5, %v655_v1, %v2345_v40  ;;  %v671_v54 = vsel %vm662_vm5, %v654_v49, %v2344_v20  ;;  %v2383_v27 = vpop.permute.xlu2 %2382 }
  0xd1   : > { %v689_v56 = vsel %vm679_vm6, %v672_v52, %v2345_v40  ;;  %v688_v57 = vsel %vm679_vm6, %v671_v54, %v2344_v20  ;;  %v2385_v37 = vunpack.i.h.bf16 %v2383_v27  ;;  %v2384_v33 = vunpack.i.l.bf16 %v2383_v27 }
  0xd2   : > { %v706_v62 = vsel %vm696_vm7, %v689_v56, %v2350_v0  ;;  %v705_v53 = vsel %vm696_vm7, %v688_v57, %v2349_v50 }
  0xd3   : > { %v722_v23 = vsel %vm713_vm8, %v705_v53, %v2349_v50  ;;  %v723_v13 = vsel %vm713_vm8, %v706_v62, %v2350_v0  ;;  %v610_v30 = vsel %vm594_vm1, %v2907_v39, %v2385_v37  ;;  %v609_v7 = vsel %vm594_vm1, %v2904_v38, %v2384_v33 }
  0xd4   : > { %v2363_v4 = vpop.permute.xlu1 %2362  ;;  %v627_v20 = vsel %vm611_vm2, %v610_v30, %v2385_v37  ;;  %v626_v12 = vsel %vm611_vm2, %v609_v7, %v2384_v33  ;;  %vm1361_vm2 = vcmask 588800  }
  0xd5   : > { %v2358_v5 = vpop.permute.xlu0 %2357  ;;  %v2365_v6 = vunpack.i.h.bf16 %v2363_v4  ;;  %v2364_v8 = vunpack.i.l.bf16 %v2363_v4 }
  0xd6   : > { %v2360_v10 = vunpack.i.h.bf16 %v2358_v5  ;;  %v2359_v11 = vunpack.i.l.bf16 %v2358_v5 }
  0xd7   : > { %v642_v14 = vsel %vm628_vm3, %v625_v63, %v2365_v6  ;;  %v641_v15 = vsel %vm628_vm3, %v624_v3, %v2364_v8 }
  0xd8   : > { %v739_v16 = vsel %vm730_vm9, %v722_v23, %v2359_v11  ;;  %v740_v18 = vsel %vm730_vm9, %v723_v13, %v2360_v10  ;;  %v659_v19 = vsel %vm645_vm4, %v642_v14, %v2365_v6  ;;  %v658_v22 = vsel %vm645_vm4, %v641_v15, %v2364_v8  ;;  %v2398_v40 = vpop.permute.xlu2 %2397 }
  0xd9   : > { %v756_v24 = vsel %vm747_vm10, %v739_v16, %v2359_v11  ;;  %v757_v25 = vsel %vm747_vm10, %v740_v18, %v2360_v10  ;;  %v675_v28 = vsel %vm662_vm5, %v658_v22, %v2369_v60  ;;  %v676_v32 = vsel %vm662_vm5, %v659_v19, %v2370_v9 }
  0xda   : > { %v774_v26 = vpack.c.bf16 %v757_v25, %v756_v24  ;;  %v692_v36 = vsel %vm679_vm6, %v675_v28, %v2369_v60  ;;  %v693_v17 = vsel %vm679_vm6, %v676_v32, %v2370_v9  ;;  %v2400_v54 = vunpack.i.h.bf16 %v2398_v40 }
  0xdb   : > { %v2399_v56 = vunpack.i.l.bf16 %v2398_v40 }
  0xdc   : > { %2070 = vmatmul.msk.bf16.gmra.mxu0 %vm796_vm11, %v774_v26  ;;  %v2378_v43 = vpop.permute.xlu1 %2377 }
  0xdd   : > { %v2373_v31 = vpop.permute.xlu0 %2372  ;;  %v2380_v34 = vunpack.i.h.bf16 %v2378_v43  ;;  %v2379_v35 = vunpack.i.l.bf16 %v2378_v43 }
  0xde   : > { %v2375_v61 = vunpack.i.h.bf16 %v2373_v31  ;;  %v2374_v29 = vunpack.i.l.bf16 %v2373_v31 }
  0xe0   : > { %v710_v41 = vsel %vm696_vm7, %v693_v17, %v2375_v61  ;;  %v709_v42 = vsel %vm696_vm7, %v692_v36, %v2374_v29 }
  0xe1   : > { %v727_v44 = vsel %vm713_vm8, %v710_v41, %v2375_v61  ;;  %v726_v45 = vsel %vm713_vm8, %v709_v42, %v2374_v29  ;;  %v2716_v42 = vmov 0.0  }
  0xe2   : > { %v743_v46 = vsel %vm730_vm9, %v726_v45, %v2379_v35  ;;  %v744_v47 = vsel %vm730_vm9, %v727_v44, %v2380_v34  ;;  %v993_v44 = vrot.slane %v2716_v42, 7 }
  0xe3   : > { %v760_v21 = vsel %vm747_vm10, %v743_v46, %v2379_v35  ;;  %v761_v51 = vsel %vm747_vm10, %v744_v47, %v2380_v34  ;;  %v3221_v34 = vld [vmem:[%s3826_s4] sm:$0x3f] }
  0xe4   : > { %v776_v2 = vpack.c.bf16 %v761_v51, %v760_v21  ;;  %v2393_v49 = vpop.permute.xlu1 %2392  ;;  %v3224_v17 = vperm.slane %v3221_v34, 0  ;;  %v3227_v45 = vperm.slane %v3221_v34, 1  ;;  %v3231_v30 = vsel %vm1011_vm12, 0.0, %v993_v44 }
  0xe5   : > { %v2388_v48 = vpop.permute.xlu0 %2387  ;;  %v2395_v39 = vunpack.i.h.bf16 %v2393_v49  ;;  %v2394_v50 = vunpack.i.l.bf16 %v2393_v49  ;;  %v1021_v7 = vsel %vm1011_vm12, %v993_v44, 0.0  ;;  %v1046_v51 = vrot.slane %v3231_v30, 1 }
  0xe6   : > { %v2390_v1 = vunpack.i.h.bf16 %v2388_v48  ;;  %v2389_v0 = vunpack.i.l.bf16 %v2388_v48  ;;  %2072 = vmatmul.msk.bf16.gmra.mxu3 %vm796_vm11, %v776_v2  ;;  %v1047_v40 = vrot.slane %v1021_v7, 1 }
  0xe8   : > { %v644_v38 = vsel %vm628_vm3, %v627_v20, %v2390_v1  ;;  %v643_v52 = vsel %vm628_vm3, %v626_v12, %v2389_v0  ;;  %v1095_v20 = vrot.slane %v3231_v30, 2  ;;  %v1096_v12 = vrot.slane %v1021_v7, 2 }
  0xe9   : > { %v661_v57 = vsel %vm645_vm4, %v644_v38, %v2390_v1  ;;  %v660_v58 = vsel %vm645_vm4, %v643_v52, %v2389_v0  ;;  %v3245_v0 = vsel %vm295_vm0, %v1046_v51, %v1047_v40  ;;  %vm3451_vm4 = vmpackc.low %vm1361_vm2, %vm1361_vm2 }
  0xea   : > { %v677_v59 = vsel %vm662_vm5, %v660_v58, %v2394_v50  ;;  %v678_v55 = vsel %vm662_vm5, %v661_v57, %v2395_v39 }
  0xeb   : > { %v694_v62 = vsel %vm679_vm6, %v677_v59, %v2394_v50  ;;  %v695_v53 = vsel %vm679_vm6, %v678_v55, %v2395_v39  ;;  %v3248_v39 = vsel %vm1094_vm13, %v1095_v20, %v1096_v12 }
  0xec   : > { %v711_v63 = vsel %vm696_vm7, %v694_v62, %v2399_v56  ;;  %v712_v3 = vsel %vm696_vm7, %v695_v53, %v2400_v54 }
  0xed   : > { %v728_v4 = vsel %vm713_vm8, %v711_v63, %v2399_v56  ;;  %v729_v5 = vsel %vm713_vm8, %v712_v3, %v2400_v54  ;;  %v2403_v6 = vpop.permute.xlu0 %2402 }
  0xee   : > { %v2405_v8 = vunpack.i.h.bf16 %v2403_v6  ;;  %v2404_v10 = vunpack.i.l.bf16 %v2403_v6 }
  0xf0   : > { %v745_v11 = vsel %vm730_vm9, %v728_v4, %v2404_v10  ;;  %v746_v23 = vsel %vm730_vm9, %v729_v5, %v2405_v8 }
  0xf1   : > { %v762_v13 = vsel %vm747_vm10, %v745_v11, %v2404_v10  ;;  %v763_v9 = vsel %vm747_vm10, %v746_v23, %v2405_v8 }
  0xf2   : > { %v777_v60 = vpack.c.bf16 %v763_v9, %v762_v13 }
  0xf6   : > { %2073 = vmatmul.msk.bf16.gmra.mxu3 %vm796_vm11, %v777_v60 }
 0x119   : > { %v830_v14 = vpop.f32.mrf.mxu0 }
 0x11a   : > { %886 = vrot.lane.b32.xlu1 %v830_v14, %s2715_s10 }
 0x121   : > { %v832_v15 = vpop.f32.mrf.mxu0 }
 0x129   : > { %v3159_v16 = vpop.f32.mrf.mxu0 }
 0x131   : > { %v3161_v18 = vpop.f32.mrf.mxu0 }
 0x132   : > { %892 = vrot.lane.b32.xlu1 %v3161_v18, %s2715_s10 }
 0x139   : > { %v3165_v19 = vpop.f32.mrf.mxu0 }
 0x141   : > { %v3171_v24 = vpop.f32.mrf.mxu0 }
 0x149   : > { %v3178_v26 = vpop.f32.mrf.mxu0 }
 0x14f   : > { %v3167_v22 = vpop.f32.mrf.mxu3 }
 0x150   : > { %906 = vrot.lane.b32.xlu2 %v3167_v22, %s2715_s10 }
 0x151   : > { %v3184_v27 = vpop.f32.mrf.mxu0 }
 0x157   : > { %v3173_v25 = vpop.f32.mrf.mxu3 }
 0x158   : > { %908 = vrot.lane.b32.xlu0 %v3173_v25, %s2715_s10  ;;  %888 = vrot.lane.b32.xlu2 %v832_v15, %s2715_s10 }
 0x159   : > { %v3194_v32 = vpop.f32.mrf.mxu0 }
 0x160   : > { %890 = vrot.lane.b32.xlu0 %v3159_v16, %s2715_s10  ;;  %894 = vrot.lane.b32.xlu2 %v3165_v19, %s2715_s10 }
 0x161   : > { %v3202_v43 = vpop.f32.mrf.mxu0 }
 0x168   : > { %896 = vrot.lane.b32.xlu0 %v3171_v24, %s2715_s10  ;;  %900 = vrot.lane.b32.xlu2 %v3184_v27, %s2715_s10 }
 0x169   : > { %v3190_v28 = vpop.f32.mrf.mxu3 }
 0x16a   : > { %910 = vrot.lane.b32.xlu1 %v3190_v28, %s2715_s10 }
 0x171   : > { %v3196_v31 = vpop.f32.mrf.mxu3 }
 0x172   : > { %898 = vrot.lane.b32.xlu1 %v3178_v26, %s2715_s10  ;;  %912 = vrot.lane.b32.xlu2 %v3196_v31, %s2715_s10 }
 0x179   : > { %v3204_v37 = vpop.f32.mrf.mxu3 }
 0x17a   : > { %914 = vrot.lane.b32.xlu0 %v3204_v37, %s2715_s10  ;;  %904 = vrot.lane.b32.xlu1 %v3202_v43, %s2715_s10 }
 0x181   : > { %v3210_v33 = vpop.f32.mrf.mxu3 }
 0x182   : > { %902 = vrot.lane.b32.xlu0 %v3194_v32, %s2715_s10  ;;  %916 = vrot.lane.b32.xlu1 %v3210_v33, %s2715_s10 }
 0x18c   : > { %v887_v29 = vpop.permute.xlu1 %886 }
 0x18d   : > { %v934_v36 = vmax.f32 %v830_v14, %v887_v29 }
 0x1a4   : > { %v893_v62 = vpop.permute.xlu1 %892 }
 0x1a5   : > { %v937_v63 = vmax.f32 %v3161_v18, %v893_v62 }
 0x1aa   : > { %v3216_v61 = vpop.permute.xlu2 %906 }
 0x1b2   : > { %v889_v35 = vpop.permute.xlu2 %888 }
 0x1b3   : > { %v935_v41 = vmax.f32 %v832_v15, %v889_v35 }
 0x1b5   : > { %v950_v46 = vmax.f32 %v934_v36, %v935_v41 }
 0x1b7   : > { %v959_v47 = vmul.f32 %v3224_v17, %v950_v46 }
 0x1b9   : > { %v968_v21 = vadd.f32 %v3227_v45, %v959_v47 }
 0x1ba   : > { %v895_v4 = vpop.permute.xlu2 %894 }
 0x1bb   : > { %v3236_v2 = vmax.f32 %v968_v21, 0.0  ;;  %v938_v11 = vmax.f32 %v3165_v19, %v895_v4 }
 0x1bd   : > { %v994_v48 = vrot.slane %v3236_v2, 7 }
 0x1bf   : > { %v3241_v49 = vsel %vm1011_vm12, 0.0, %v994_v48  ;;  %v1022_v1 = vsel %vm1011_vm12, %v994_v48, 0.0 }
 0x1c0   : > { %v1049_v50 = vrot.slane %v3241_v49, 1  ;;  %v1050_v38 = vrot.slane %v1022_v1, 1  ;;  %v1098_v52 = vrot.slane %v3241_v49, 2  ;;  %v1099_v54 = vrot.slane %v1022_v1, 2 }
 0x1c2   : > { %v1051_v56 = vsel %vm295_vm0, %v1049_v50, %v1050_v38  ;;  %v1100_v57 = vsel %vm1094_vm13, %v1098_v52, %v1099_v54  ;;  %v901_v15 = vpop.permute.xlu2 %900 }
 0x1c3   : > { %v2406_v58 = vpack.i.bf16 %v1051_v56, %v3245_v0  ;;  %v2411_v59 = vpack.i.bf16 %v1100_v57, %v3248_v39  ;;  %v941_v40 = vmax.f32 %v3184_v27, %v901_v15 }
 0x1c5   : > { %2407 = vrot.lane.b32.xlu2 %v2406_v58, %s2714_s28  ;;  %2412 = vrot.lane.b32.xlu0 %v2411_v59, %s2711_s25 }
 0x1ca   : > { %v909_v55 = vpop.permute.xlu0 %908 }
 0x1cb   : > { %v945_v48 = vmax.f32 %v3173_v25, %v909_v55 }
 0x1cc   : > { %v913_v1 = vpop.permute.xlu2 %912 }
 0x1cd   : > { %v947_v59 = vmax.f32 %v3196_v31, %v913_v1 }
 0x1d2   : > { %v891_v53 = vpop.permute.xlu0 %890 }
 0x1d3   : > { %v936_v3 = vmax.f32 %v3159_v16, %v891_v53 }
 0x1d5   : > { %v951_v5 = vmax.f32 %v936_v3, %v937_v63 }
 0x1d7   : > { %v960_v6 = vmul.f32 %v3224_v17, %v951_v5 }
 0x1d9   : > { %v969_v8 = vadd.f32 %v3227_v45, %v960_v6 }
 0x1da   : > { %v897_v10 = vpop.permute.xlu0 %896 }
 0x1db   : > { %v3263_v23 = vmax.f32 %v969_v8, 0.0  ;;  %v939_v13 = vmax.f32 %v3171_v24, %v897_v10 }
 0x1dc   : > { %v911_v9 = vpop.permute.xlu1 %910 }
 0x1dd   : > { %v995_v60 = vrot.slane %v3263_v23, 7  ;;  %v952_v14 = vmax.f32 %v938_v11, %v939_v13  ;;  %v946_v50 = vmax.f32 %v3190_v28, %v911_v9  ;;  %v944_v28 = vmax.f32 %v3167_v22, %v3216_v61 }
 0x1df   : > { %v961_v16 = vmul.f32 %v3224_v17, %v952_v14  ;;  %v3269_v18 = vsel %vm1011_vm12, 0.0, %v995_v60  ;;  %v1023_v29 = vsel %vm1011_vm12, %v995_v60, 0.0  ;;  %v955_v3 = vmax.f32 %v944_v28, %v945_v48 }
 0x1e0   : > { %v2416_v35 = vpack.i.bf16 %v3269_v18, %v3241_v49  ;;  %v1052_v19 = vrot.slane %v3269_v18, 1  ;;  %v1053_v36 = vrot.slane %v1023_v29, 1  ;;  %v1101_v24 = vrot.slane %v3269_v18, 2 }
 0x1e1   : > { %v970_v41 = vadd.f32 %v3227_v45, %v961_v16  ;;  %v1102_v42 = vrot.slane %v1023_v29, 2  ;;  %v956_v4 = vmax.f32 %v946_v50, %v947_v59  ;;  %v964_v31 = vmul.f32 %v3224_v17, %v955_v3 }
 0x1e2   : > { %2417 = vrot.lane.b32.xlu1 %v2416_v35, %s2713_s27  ;;  %v1054_v44 = vsel %vm295_vm0, %v1052_v19, %v1053_v36 }
 0x1e3   : > { %v3279_v46 = vmax.f32 %v970_v41, 0.0  ;;  %v2421_v47 = vpack.i.bf16 %v1054_v44, %v1051_v56  ;;  %v1103_v7 = vsel %vm1094_vm13, %v1101_v24, %v1102_v42  ;;  %v965_v61 = vmul.f32 %v3224_v17, %v956_v4 }
 0x1e4   : > { %v899_v21 = vpop.permute.xlu1 %898  ;;  %v2426_v51 = vpack.i.bf16 %v1103_v7, %v1100_v57  ;;  %v973_v15 = vadd.f32 %v3227_v45, %v964_v31 }
 0x1e5   : > { %v996_v20 = vrot.slane %v3279_v46, 7  ;;  %v940_v12 = vmax.f32 %v3178_v26, %v899_v21  ;;  %2422 = vrot.lane.b32.xlu2 %v2421_v47, %s2710_s24  ;;  %v974_v16 = vadd.f32 %v3227_v45, %v965_v61 }
 0x1e6   : > { %2427 = vrot.lane.b32.xlu0 %v2426_v51, %s2712_s26 }
 0x1e7   : > { %v953_v38 = vmax.f32 %v940_v12, %v941_v40  ;;  %v3290_v52 = vsel %vm1011_vm12, 0.0, %v996_v20  ;;  %v1024_v54 = vsel %vm1011_vm12, %v996_v20, 0.0  ;;  %v3330_v47 = vmax.f32 %v974_v16, 0.0 }
 0x1e8   : > { %v2431_v27 = vpack.i.bf16 %v3290_v52, %v3269_v18  ;;  %v1055_v26 = vrot.slane %v3290_v52, 1  ;;  %v1056_v56 = vrot.slane %v1024_v54, 1  ;;  %v1104_v57 = vrot.slane %v3290_v52, 2 }
 0x1e9   : > { %v962_v25 = vmul.f32 %v3224_v17, %v953_v38  ;;  %v1105_v58 = vrot.slane %v1024_v54, 2  ;;  %v1000_v20 = vrot.slane %v3330_v47, 7 }
 0x1ea   : > { %2432 = vrot.lane.b32.xlu1 %v2431_v27, %s2717_s13  ;;  %v1057_v55 = vsel %vm295_vm0, %v1055_v26, %v1056_v56 }
 0x1eb   : > { %v971_v62 = vadd.f32 %v3227_v45, %v962_v25  ;;  %v2436_v53 = vpack.i.bf16 %v1057_v55, %v1054_v44  ;;  %v1106_v63 = vsel %vm1094_vm13, %v1104_v57, %v1105_v58  ;;  %v3328_v44 = vmax.f32 %v973_v15, 0.0 }
 0x1ec   : > { %v915_v5 = vpop.permute.xlu0 %914  ;;  %v2441_v6 = vpack.i.bf16 %v1106_v63, %v1103_v7  ;;  %v905_v13 = vpop.permute.xlu1 %904  ;;  %v3343_v50 = vsel %vm1011_vm12, 0.0, %v1000_v20  ;;  %v1028_v54 = vsel %vm1011_vm12, %v1000_v20, 0.0 }
 0x1ed   : > { %v3305_v8 = vmax.f32 %v971_v62, 0.0  ;;  %2437 = vrot.lane.b32.xlu2 %v2436_v53, %s2718_s14  ;;  %v943_v36 = vmax.f32 %v3202_v43, %v905_v13  ;;  %v999_v40 = vrot.slane %v3328_v44, 7  ;;  %v1068_v62 = vrot.slane %v1028_v54, 1 }
 0x1ee   : > { %2442 = vrot.lane.b32.xlu0 %v2441_v6, %s2719_s15 }
 0x1ef   : > { %v997_v22 = vrot.slane %v3305_v8, 7  ;;  %v3346_v38 = vsel %vm1011_vm12, 0.0, %v999_v40  ;;  %v1027_v57 = vsel %vm1011_vm12, %v999_v40, 0.0  ;;  %v2175_v40 = vld [vmem:[%s3824_s2 + $0x38] sm:$0xff] }
 0x1f0   : > { %v1065_v31 = vrot.slane %v1027_v57, 1  ;;  %v1114_v15 = vrot.slane %v1027_v57, 2  ;;  %1438 = vmatpush.bf16.msra.mxu1 %v2175_v40 }
 0x1f1   : > { %v3313_v10 = vsel %vm1011_vm12, 0.0, %v997_v22  ;;  %v1025_v11 = vsel %vm1011_vm12, %v997_v22, 0.0  ;;  %v1064_v22 = vrot.slane %v3346_v38, 1 }
 0x1f2   : > { %2447 = vrot.lane.b32.xlu1 %v2436_v53, %s2714_s28  ;;  %v2456_v9 = vpack.i.bf16 %v3313_v10, %v3290_v52  ;;  %v1058_v60 = vrot.slane %v3313_v10, 1  ;;  %v1059_v14 = vrot.slane %v1025_v11, 1  ;;  %v1107_v35 = vrot.slane %v3313_v10, 2 }
 0x1f3   : > { %v1108_v19 = vrot.slane %v1025_v11, 2  ;;  %v1066_v11 = vsel %vm295_vm0, %v1064_v22, %v1065_v31 }
 0x1f4   : > { %v903_v29 = vpop.permute.xlu0 %902  ;;  %v1060_v41 = vsel %vm295_vm0, %v1058_v60, %v1059_v14  ;;  %v917_v48 = vpop.permute.xlu1 %916  ;;  %v1113_v14 = vrot.slane %v3346_v38, 2 }
 0x1f5   : > { %v942_v24 = vmax.f32 %v3194_v32, %v903_v29  ;;  %2452 = vrot.lane.b32.xlu2 %v2441_v6, %s2711_s25  ;;  %v2461_v7 = vpack.i.bf16 %v1060_v41, %v1057_v55  ;;  %v1109_v21 = vsel %vm1094_vm13, %v1107_v35, %v1108_v19  ;;  %v949_v27 = vmax.f32 %v3210_v33, %v917_v48 }
 0x1f6   : > { %2457 = vrot.lane.b32.xlu0 %v2456_v9, %s2713_s27  ;;  %v2466_v43 = vpack.i.bf16 %v1109_v21, %v1106_v63  ;;  %v948_v55 = vmax.f32 %v3204_v37, %v915_v5  ;;  %v1067_v33 = vrot.slane %v3343_v50, 1  ;;  %v1115_v29 = vsel %vm1094_vm13, %v1113_v14, %v1114_v15 }
 0x1f7   : > { %v954_v42 = vmax.f32 %v942_v24, %v943_v36  ;;  %v1116_v19 = vrot.slane %v3343_v50, 2  ;;  %v1117_v36 = vrot.slane %v1028_v54, 2 }
 0x1f8   : > { %v957_v4 = vmax.f32 %v948_v55, %v949_v27  ;;  %v1069_v37 = vsel %vm295_vm0, %v1067_v33, %v1068_v62  ;;  %v2170_v33 = vld [vmem:[%s3824_s2 + $0x10] sm:$0xff] }
 0x1f9   : > { %v963_v51 = vmul.f32 %v3224_v17, %v954_v42  ;;  %v2496_v13 = vpack.i.bf16 %v1069_v37, %v1066_v11 }
 0x1fa   : > { %2462 = vrot.lane.b32.xlu1 %v2461_v7, %s2710_s24  ;;  %v966_v61 = vmul.f32 %v3224_v17, %v957_v4  ;;  %v2491_v17 = vpack.i.bf16 %v3343_v50, %v3346_v38  ;;  %v1118_v7 = vsel %vm1094_vm13, %v1116_v19, %v1117_v36 }
 0x1fb   : > { %v972_v32 = vadd.f32 %v3227_v45, %v963_v51 }
 0x1fc   : > { %v975_v60 = vadd.f32 %v3227_v45, %v966_v61 }
 0x1fd   : > { %v3338_v12 = vmax.f32 %v972_v32, 0.0  ;;  %2467 = vrot.lane.b32.xlu2 %v2466_v43, %s2712_s26  ;;  %v2521_v32 = vpack.i.bf16 %v1118_v7, %v1115_v29 }
 0x1fe   : > { %v3377_v16 = vmax.f32 %v975_v60, 0.0 }
 0x1ff   : > { %v998_v1 = vrot.slane %v3338_v12, 7 }
 0x200   : > { %v1001_v35 = vrot.slane %v3377_v16, 7 }
 0x201   : > { %v3351_v26 = vsel %vm1011_vm12, 0.0, %v998_v1  ;;  %v1026_v56 = vsel %vm1011_vm12, %v998_v1, 0.0 }
 0x202   : > { %v2471_v25 = vpack.i.bf16 %v3351_v26, %v3313_v10  ;;  %v2476_v58 = vpack.i.bf16 %v3346_v38, %v3351_v26  ;;  %v1061_v28 = vrot.slane %v3351_v26, 1  ;;  %v1062_v59 = vrot.slane %v1026_v56, 1 }
 0x203   : > { %v1110_v63 = vrot.slane %v3351_v26, 2  ;;  %v1111_v3 = vrot.slane %v1026_v56, 2  ;;  %v1020_v24 = vsel %vm1011_vm12, 0.0, %v1001_v35  ;;  %v2174_v56 = vld [vmem:[%s3824_s2 + $0x30] sm:$0xff] }
 0x204   : > { %2472 = vrot.lane.b32.xlu0 %v2471_v25, %s2717_s13  ;;  %v1063_v53 = vsel %vm295_vm0, %v1061_v28, %v1062_v59  ;;  %v1196_v48 = vrot.slane %v1020_v24, 2  ;;  %v2536_v54 = vpack.i.bf16 %v1020_v24, %v3343_v50  ;;  %1439 = vmatpush.bf16.msra.mxu1 %v2174_v56  ;;  %v2173_v25 = vld [vmem:[%s3824_s2 + $0x28] sm:$0xff]  ;;  %v2551_v28 = vpack.i.bf16 %v3231_v30, %v1020_v24  ;;  %v2172_v59 = vld [vmem:[%s3824_s2 + $0x20] sm:$0xff] }
 0x205   : > { %2477 = vrot.lane.b32.xlu2 %v2476_v58, %s2713_s27  ;;  %v2481_v6 = vpack.i.bf16 %v1063_v53, %v1060_v41  ;;  %v1112_v5 = vsel %vm1094_vm13, %v1110_v63, %v1111_v3  ;;  %v1029_v41 = vsel %vm1011_vm12, %v1001_v35, 0.0  ;;  %v2511_v42 = vpack.i.bf16 %v1066_v11, %v1063_v53  ;;  %v2169_v53 = vld [vmem:[%s3824_s2 + $0x8] sm:$0xff] }
 0x206   : > { %v2486_v9 = vpack.i.bf16 %v1112_v5, %v1109_v21  ;;  %v2516_v45 = vpack.i.bf16 %v1115_v29, %v1112_v5  ;;  %v1169_v21 = vrot.slane %v1020_v24, 1  ;;  %v1170_v51 = vrot.slane %v1029_v41, 1 }
 0x207   : > { %2482 = vrot.lane.b32.xlu1 %v2481_v6, %s2718_s14  ;;  %v1197_v1 = vrot.slane %v1029_v41, 2 }
 0x208   : > { %v1171_v43 = vsel %vm295_vm0, %v1169_v21, %v1170_v51  ;;  %1440 = vmatpush.bf16.msra.mxu1 %v2173_v25 }
 0x209   : > { %v2541_v20 = vpack.i.bf16 %v1171_v43, %v1069_v37  ;;  %v1198_v27 = vsel %vm1094_vm13, %v1196_v48, %v1197_v1  ;;  %v2556_v58 = vpack.i.bf16 %v3245_v0, %v1171_v43  ;;  %v2171_v0 = vld [vmem:[%s3824_s2 + $0x18] sm:$0xff] }
 0x20a   : > { %v2546_v57 = vpack.i.bf16 %v1198_v27, %v1118_v7  ;;  %v2561_v55 = vpack.i.bf16 %v3248_v39, %v1198_v27  ;;  %v2168_v39 = vld [vmem:[%s3824_s2] sm:$0xff] }
 0x20c   : > { %2497 = vrot.lane.b32.xlu0 %v2496_v13, %s2718_s14  ;;  %1441 = vmatpush.bf16.msra.mxu1 %v2172_v59 }
 0x20d   : > { %2487 = vrot.lane.b32.xlu2 %v2486_v9, %s2719_s15 }
 0x20f   : > { %2507 = vrot.lane.b32.xlu1 %v2486_v9, %s2711_s25 }
 0x210   : > { %1442 = vmatpush.bf16.msra.mxu1 %v2171_v0 }
 0x214   : > { %2502 = vrot.lane.b32.xlu0 %v2481_v6, %s2714_s28  ;;  %1443 = vmatpush.bf16.msra.mxu1 %v2170_v33 }
 0x215   : > { %2492 = vrot.lane.b32.xlu2 %v2491_v17, %s2717_s13 }
 0x217   : > { %2517 = vrot.lane.b32.xlu1 %v2516_v45, %s2712_s26 }
 0x218   : > { %1444 = vmatpush.bf16.msra.mxu1 %v2169_v53 }
 0x21c   : > { %2512 = vrot.lane.b32.xlu0 %v2511_v42, %s2710_s24  ;;  %1445 = vmatpush.bf16.msra.mxu1 %v2168_v39 }
 0x21d   : > { %2527 = vrot.lane.b32.xlu2 %v2496_v13, %s2714_s28 }
 0x21f   : > { %2522 = vrot.lane.b32.xlu1 %v2521_v32, %s2719_s15  ;;  %v2408_v62 = vpop.permute.xlu2 %2407 }
 0x220   : > { %v2410_v6 = vunpack.i.h.bf16 %v2408_v62  ;;  %v2409_v22 = vunpack.i.l.bf16 %v2408_v62 }
 0x222   : > { %v1296_v13 = vsel %vm594_vm1, %v3241_v49, %v2410_v6  ;;  %v1295_v9 = vsel %vm594_vm1, %v3231_v30, %v2409_v22 }
 0x224   : > { %2532 = vrot.lane.b32.xlu0 %v2521_v32, %s2711_s25 }
 0x225   : > { %2542 = vrot.lane.b32.xlu2 %v2541_v20, %s2710_s24 }
 0x227   : > { %2537 = vrot.lane.b32.xlu1 %v2536_v54, %s2713_s27 }
 0x22c   : > { %2547 = vrot.lane.b32.xlu0 %v2546_v57, %s2712_s26 }
 0x22d   : > { %2557 = vrot.lane.b32.xlu2 %v2556_v58, %s2718_s14 }
 0x22f   : > { %2552 = vrot.lane.b32.xlu1 %v2551_v28, %s2717_s13 }
 0x234   : > { %2562 = vrot.lane.b32.xlu0 %v2561_v55, %s2719_s15 }
 0x237   : > { %v2413_v3 = vpop.permute.xlu0 %2412 }
 0x238   : > { %v2415_v31 = vunpack.i.h.bf16 %v2413_v3  ;;  %v2414_v37 = vunpack.i.l.bf16 %v2413_v3 }
 0x23a   : > { %v1304_v60 = vsel %vm628_vm3, %v1296_v13, %v2415_v31  ;;  %v3436_v14 = vsel %vm628_vm3, %v1295_v9, %v2414_v37 }
 0x23f   : > { %v2423_v63 = vpop.permute.xlu2 %2422 }
 0x240   : > { %v2425_v35 = vunpack.i.h.bf16 %v2423_v63  ;;  %v2424_v45 = vunpack.i.l.bf16 %v2423_v63 }
 0x247   : > { %v2438_v4 = vpop.permute.xlu2 %2437 }
 0x248   : > { %v2440_v21 = vunpack.i.h.bf16 %v2438_v4  ;;  %v2439_v51 = vunpack.i.l.bf16 %v2438_v4 }
 0x24f   : > { %v2453_v19 = vpop.permute.xlu2 %2452 }
 0x250   : > { %v2455_v4 = vunpack.i.h.bf16 %v2453_v19  ;;  %v2454_v6 = vunpack.i.l.bf16 %v2453_v19 }
 0x254   : > { %v2418_v5 = vpop.permute.xlu1 %2417 }
 0x255   : > { %v2420_v61 = vunpack.i.h.bf16 %v2418_v5  ;;  %v2419_v11 = vunpack.i.l.bf16 %v2418_v5 }
 0x257   : > { %v1312_v15 = vsel %vm662_vm5, %v1304_v60, %v2420_v61  ;;  %v1311_v17 = vsel %vm662_vm5, %v3436_v14, %v2419_v11  ;;  %v2468_v28 = vpop.permute.xlu2 %2467 }
 0x258   : > { %v2428_v29 = vpop.permute.xlu0 %2427  ;;  %v1319_v49 = vsel %vm696_vm7, %v1311_v17, %v2424_v45  ;;  %v1320_v30 = vsel %vm696_vm7, %v1312_v15, %v2425_v35  ;;  %v2469_v35 = vunpack.i.l.bf16 %v2468_v28 }
 0x259   : > { %v2430_v36 = vunpack.i.h.bf16 %v2428_v29  ;;  %v2429_v24 = vunpack.i.l.bf16 %v2428_v29  ;;  %v2470_v29 = vunpack.i.h.bf16 %v2468_v28 }
 0x25b   : > { %v1327_v32 = vsel %vm730_vm9, %v1319_v49, %v2429_v24  ;;  %v1328_v43 = vsel %vm730_vm9, %v1320_v30, %v2430_v36 }
 0x25c   : > { %v2433_v41 = vpop.permute.xlu1 %2432 }
 0x25d   : > { %v2435_v42 = vunpack.i.h.bf16 %v2433_v41  ;;  %v2434_v7 = vunpack.i.l.bf16 %v2433_v41 }
 0x25f   : > { %v1335_v40 = vsel %vm796_vm11, %v1327_v32, %v2434_v7  ;;  %v1336_v20 = vsel %vm796_vm11, %v1328_v43, %v2435_v42  ;;  %v3457_v62 = vpop.permute.xlu2 %2477 }
 0x260   : > { %v2443_v48 = vpop.permute.xlu0 %2442  ;;  %v1344_v1 = vsel %vm1343_vm14, %v1335_v40, %v2439_v51  ;;  %v1345_v54 = vsel %vm1343_vm14, %v1336_v20, %v2440_v21 }
 0x261   : > { %v2445_v27 = vunpack.i.h.bf16 %v2443_v48  ;;  %v2444_v56 = vunpack.i.l.bf16 %v2443_v48 }
 0x263   : > { %v1353_v57 = vsel %vm1352_vm15, %v1344_v1, %v2444_v56  ;;  %v1354_v25 = vsel %vm1352_vm15, %v1345_v54, %v2445_v27 }
 0x264   : > { %v2107_v59 = vpack.c.bf16 %v1354_v25, %v1353_v57  ;;  %v2448_v55 = vpop.permute.xlu1 %2447 }
 0x265   : > { %v2450_v0 = vunpack.i.h.bf16 %v2448_v55  ;;  %v2449_v33 = vunpack.i.l.bf16 %v2448_v55 }
 0x266   : > { %2108 = vmatmul.msk.bf16.vlgmr.msra.gmra.mxu1 %vm3451_vm4, %v2107_v59 }
 0x267   : > { %v1298_v39 = vsel %vm594_vm1, %v3290_v52, %v2450_v0  ;;  %v1297_v63 = vsel %vm594_vm1, %v3269_v18, %v2449_v33  ;;  %v2488_v45 = vpop.permute.xlu2 %2487 }
 0x268   : > { %v2458_v53 = vpop.permute.xlu0 %2457  ;;  %v1305_v37 = vsel %vm628_vm3, %v1297_v63, %v2454_v6  ;;  %v1306_v5 = vsel %vm628_vm3, %v1298_v39, %v2455_v4  ;;  %v2490_v41 = vunpack.i.h.bf16 %v2488_v45  ;;  %v2489_v42 = vunpack.i.l.bf16 %v2488_v45 }
 0x269   : > { %v2460_v22 = vunpack.i.h.bf16 %v2458_v53  ;;  %v2459_v31 = vunpack.i.l.bf16 %v2458_v53  ;;  %v2480_v39 = vunpack.i.h.bf16 %v3457_v62  ;;  %v2479_v63 = vunpack.i.l.bf16 %v3457_v62 }
 0x26b   : > { %v1313_v13 = vsel %vm662_vm5, %v1305_v37, %v2459_v31  ;;  %v1314_v9 = vsel %vm662_vm5, %v1306_v5, %v2460_v22 }
 0x26c   : > { %v2463_v3 = vpop.permute.xlu1 %2462 }
 0x26d   : > { %v2465_v61 = vunpack.i.h.bf16 %v2463_v3  ;;  %v2464_v11 = vunpack.i.l.bf16 %v2463_v3 }
 0x26f   : > { %v1321_v52 = vsel %vm696_vm7, %v1313_v13, %v2464_v11  ;;  %v1322_v18 = vsel %vm696_vm7, %v1314_v9, %v2465_v61  ;;  %v2493_v54 = vpop.permute.xlu2 %2492 }
 0x270   : > { %v1329_v36 = vsel %vm730_vm9, %v1321_v52, %v2469_v35  ;;  %v1330_v24 = vsel %vm730_vm9, %v1322_v18, %v2470_v29  ;;  %v2495_v4 = vunpack.i.h.bf16 %v2493_v54  ;;  %v2494_v6 = vunpack.i.l.bf16 %v2493_v54 }
 0x276   : > { %v2473_v60 = vpop.permute.xlu0 %2472 }
 0x277   : > { %v2475_v15 = vunpack.i.h.bf16 %v2473_v60  ;;  %v2474_v17 = vunpack.i.l.bf16 %v2473_v60  ;;  %v2528_v22 = vpop.permute.xlu2 %2527 }
 0x279   : > { %v2483_v19 = vpop.permute.xlu1 %2482  ;;  %v1337_v7 = vsel %vm796_vm11, %v1329_v36, %v2474_v17  ;;  %v1338_v21 = vsel %vm796_vm11, %v1330_v24, %v2475_v15 }
 0x27a   : > { %v2485_v49 = vunpack.i.h.bf16 %v2483_v19  ;;  %v2484_v30 = vunpack.i.l.bf16 %v2483_v19 }
 0x27c   : > { %v1346_v51 = vsel %vm1343_vm14, %v1337_v7, %v2484_v30  ;;  %v1347_v32 = vsel %vm1343_vm14, %v1338_v21, %v2485_v49  ;;  %v2530_v7 = vunpack.i.h.bf16 %v2528_v22  ;;  %v2529_v21 = vunpack.i.l.bf16 %v2528_v22 }
 0x27d   : > { %v1355_v43 = vsel %vm1352_vm15, %v1346_v51, %v2489_v42  ;;  %v1356_v40 = vsel %vm1352_vm15, %v1347_v32, %v2490_v41 }
 0x27e   : > { %v2498_v20 = vpop.permute.xlu0 %2497  ;;  %v2110_v48 = vpack.c.bf16 %v1356_v40, %v1355_v43 }
 0x27f   : > { %v2500_v11 = vunpack.i.h.bf16 %v2498_v20  ;;  %v2499_v13 = vunpack.i.l.bf16 %v2498_v20  ;;  %v2543_v41 = vpop.permute.xlu2 %2542  ;;  %v1302_v20 = vsel %vm594_vm1, %v3343_v50, %v2530_v7 }
 0x280   : > { %2111 = vmatmul.msk.bf16.gmra.mxu1 %vm3451_vm4, %v2110_v48  ;;  %v1301_v48 = vsel %vm594_vm1, %v3346_v38, %v2529_v21 }
 0x281   : > { %v2508_v1 = vpop.permute.xlu1 %2507 }
 0x282   : > { %v2510_v55 = vunpack.i.h.bf16 %v2508_v1  ;;  %v2509_v0 = vunpack.i.l.bf16 %v2508_v1 }
 0x286   : > { %v2503_v27 = vpop.permute.xlu0 %2502 }
 0x287   : > { %v2505_v56 = vunpack.i.h.bf16 %v2503_v27  ;;  %v2504_v57 = vunpack.i.l.bf16 %v2503_v27  ;;  %v3513_v38 = vpop.permute.xlu2 %2557 }
 0x288   : > { %v2560_v22 = vunpack.i.h.bf16 %v3513_v38 }
 0x289   : > { %v2518_v25 = vpop.permute.xlu1 %2517  ;;  %v1300_v28 = vsel %vm594_vm1, %v3351_v26, %v2505_v56  ;;  %v1299_v59 = vsel %vm594_vm1, %v3313_v10, %v2504_v57 }
 0x28a   : > { %v1307_v33 = vsel %vm628_vm3, %v1299_v59, %v2509_v0  ;;  %v1308_v53 = vsel %vm628_vm3, %v1300_v28, %v2510_v55  ;;  %v2520_v26 = vunpack.i.h.bf16 %v2518_v25  ;;  %v2519_v5 = vunpack.i.l.bf16 %v2518_v25 }
 0x28b   : > { %v1315_v10 = vsel %vm662_vm5, %v1307_v33, %v2479_v63  ;;  %v1316_v61 = vsel %vm662_vm5, %v1308_v53, %v2480_v39  ;;  %v2545_v59 = vunpack.i.h.bf16 %v2543_v41  ;;  %v2544_v55 = vunpack.i.l.bf16 %v2543_v41 }
 0x28e   : > { %v2513_v3 = vpop.permute.xlu0 %2512 }
 0x28f   : > { %v2515_v31 = vunpack.i.h.bf16 %v2513_v3  ;;  %v2514_v37 = vunpack.i.l.bf16 %v2513_v3 }
 0x291   : > { %v1323_v9 = vsel %vm696_vm7, %v1315_v10, %v2514_v37  ;;  %v1324_v60 = vsel %vm696_vm7, %v1316_v61, %v2515_v31  ;;  %v2523_v52 = vpop.permute.xlu1 %2522  ;;  %v2559_v31 = vunpack.i.l.bf16 %v3513_v38  ;;  %v2701_v38 = vld [vmem:[%s3826_s4] sm:$0x3f] }
 0x292   : > { %v1331_v62 = vsel %vm730_vm9, %v1323_v9, %v2519_v5  ;;  %v1332_v18 = vsel %vm730_vm9, %v1324_v60, %v2520_v26  ;;  %v2525_v15 = vunpack.i.h.bf16 %v2523_v52  ;;  %v2524_v17 = vunpack.i.l.bf16 %v2523_v52 }
 0x293   : > { %v1339_v29 = vsel %vm796_vm11, %v1331_v62, %v2494_v6  ;;  %v1340_v35 = vsel %vm796_vm11, %v1332_v18, %v2495_v4  ;;  %v3540_v60 = vperm.slane %v3221_v34, 2  ;;  %v3543_v52 = vperm.slane %v3221_v34, 3 }
 0x294   : > { %v1348_v45 = vsel %vm1343_vm14, %v1339_v29, %v2499_v13  ;;  %v1349_v19 = vsel %vm1343_vm14, %v1340_v35, %v2500_v11 }
 0x295   : > { %v1357_v36 = vsel %vm1352_vm15, %v1348_v45, %v2524_v17  ;;  %v1358_v24 = vsel %vm1352_vm15, %v1349_v19, %v2525_v15 }
 0x296   : > { %v2533_v49 = vpop.permute.xlu0 %2532  ;;  %v2113_v30 = vpack.c.bf16 %v1358_v24, %v1357_v36 }
 0x297   : > { %v2535_v51 = vunpack.i.h.bf16 %v2533_v49  ;;  %v2534_v32 = vunpack.i.l.bf16 %v2533_v49 }
 0x298   : > { %2114 = vmatmul.msk.bf16.gmra.mxu1 %vm3451_vm4, %v2113_v30 }
 0x299   : > { %v2538_v42 = vpop.permute.xlu1 %2537  ;;  %v1310_v54 = vsel %vm628_vm3, %v1302_v20, %v2535_v51  ;;  %v1309_v27 = vsel %vm628_vm3, %v1301_v48, %v2534_v32 }
 0x29a   : > { %v2540_v43 = vunpack.i.h.bf16 %v2538_v42  ;;  %v2539_v40 = vunpack.i.l.bf16 %v2538_v42 }
 0x29c   : > { %v1318_v56 = vsel %vm662_vm5, %v1310_v54, %v2540_v43  ;;  %v1317_v57 = vsel %vm662_vm5, %v1309_v27, %v2539_v40 }
 0x29d   : > { %v1325_v53 = vsel %vm696_vm7, %v1317_v57, %v2544_v55  ;;  %v1326_v39 = vsel %vm696_vm7, %v1318_v56, %v2545_v59 }
 0x29e   : > { %v2548_v1 = vpop.permute.xlu0 %2547 }
 0x29f   : > { %v2550_v25 = vunpack.i.h.bf16 %v2548_v1  ;;  %v2549_v28 = vunpack.i.l.bf16 %v2548_v1 }
 0x2a1   : > { %v3509_v0 = vpop.permute.xlu1 %2552  ;;  %v1333_v63 = vsel %vm730_vm9, %v1325_v53, %v2549_v28  ;;  %v1334_v3 = vsel %vm730_vm9, %v1326_v39, %v2550_v25 }
 0x2a2   : > { %v2555_v50 = vunpack.i.h.bf16 %v3509_v0  ;;  %v2554_v33 = vunpack.i.l.bf16 %v3509_v0 }
 0x2a4   : > { %v1341_v4 = vsel %vm796_vm11, %v1333_v63, %v2554_v33  ;;  %v1342_v6 = vsel %vm796_vm11, %v1334_v3, %v2555_v50 }
 0x2a5   : > { %v1350_v10 = vsel %vm1343_vm14, %v1341_v4, %v2559_v31  ;;  %v1351_v61 = vsel %vm1343_vm14, %v1342_v6, %v2560_v22 }
 0x2a6   : > { %v3525_v37 = vpop.permute.xlu0 %2562 }
 0x2a7   : > { %v2565_v26 = vunpack.i.h.bf16 %v3525_v37  ;;  %v2564_v5 = vunpack.i.l.bf16 %v3525_v37 }
 0x2a9   : > { %v1359_v11 = vsel %vm1352_vm15, %v1350_v10, %v2564_v5  ;;  %v1360_v13 = vsel %vm1352_vm15, %v1351_v61, %v2565_v26 }
 0x2aa   : > { %v2116_v9 = vpack.c.bf16 %v1360_v13, %v1359_v11 }
 0x2ac   : > { %2117 = vmatmul.msk.bf16.gmra.mxu1 %vm3451_vm4, %v2116_v9 }
 0x2e3   : > { %v1447_v62 = vpop.f32.mrf.mxu1 }
 0x2e4   : > { %v1468_v18 = vmul.f32 %v3540_v60, %v1447_v62 }
 0x2e6   : > { %v1477_v15 = vadd.f32 %v3543_v52, %v1468_v18 }
 0x2e8   : > { %v1485_v17 = vmax.f32 %v1477_v15, 0.0 }
 0x2ea   : > { %v1501_v35 = vrot.slane %v1485_v17, 7 }
 0x2eb   : > { %v1449_v29 = vpop.f32.mrf.mxu1 }
 0x2ec   : > { %v1469_v45 = vmul.f32 %v3540_v60, %v1449_v29  ;;  %v3550_v36 = vsel %vm1011_vm12, 0.0, %v1501_v35  ;;  %v1525_v24 = vsel %vm1011_vm12, %v1501_v35, 0.0 }
 0x2ed   : > { %v1590_v30 = vrot.slane %v1525_v24, 2  ;;  %v1589_v41 = vrot.slane %v3550_v36, 2  ;;  %v1548_v42 = vrot.slane %v1525_v24, 1  ;;  %v1547_v51 = vrot.slane %v3550_v36, 1 }
 0x2ee   : > { %v1478_v19 = vadd.f32 %v3543_v52, %v1469_v45 }
 0x2ef   : > { %v1591_v1 = vsel %vm1094_vm13, %v1589_v41, %v1590_v30  ;;  %v1549_v56 = vsel %vm295_vm0, %v1547_v51, %v1548_v42 }
 0x2f0   : > { %v1486_v49 = vmax.f32 %v1478_v19, 0.0 }
 0x2f2   : > { %v1502_v34 = vrot.slane %v1486_v49, 7 }
 0x2f4   : > { %v3555_v7 = vsel %vm1011_vm12, 0.0, %v1502_v34  ;;  %v1526_v21 = vsel %vm1011_vm12, %v1502_v34, 0.0 }
 0x2f5   : > { %v1551_v32 = vrot.slane %v1526_v21, 1  ;;  %v1593_v43 = vrot.slane %v1526_v21, 2  ;;  %v2566_v40 = vpack.i.bf16 %v3555_v7, %v3550_v36  ;;  %v1592_v20 = vrot.slane %v3555_v7, 2 }
 0x2f6   : > { %v1550_v48 = vrot.slane %v3555_v7, 1 }
 0x2f7   : > { %2567 = vrot.lane.b32.xlu0 %v2566_v40, %s2713_s27  ;;  %v1594_v54 = vsel %vm1094_vm13, %v1592_v20, %v1593_v43 }
 0x2f8   : > { %v2576_v27 = vpack.i.bf16 %v1594_v54, %v1591_v1  ;;  %v1552_v57 = vsel %vm295_vm0, %v1550_v48, %v1551_v32 }
 0x2f9   : > { %v2571_v25 = vpack.i.bf16 %v1552_v57, %v1549_v56 }
 0x2fa   : > { %2577 = vrot.lane.b32.xlu2 %v2576_v27, %s2711_s25 }
 0x2fb   : > { %2572 = vrot.lane.b32.xlu1 %v2571_v25, %s2714_s28 }
 0x2fd   : > { %v1452_v28 = vpop.f32.mrf.mxu1 }
 0x2fe   : > { %v1470_v59 = vmul.f32 %v3540_v60, %v1452_v28 }
 0x300   : > { %v1479_v55 = vadd.f32 %v3543_v52, %v1470_v59 }
 0x302   : > { %v1487_v33 = vmax.f32 %v1479_v55, 0.0  ;;  %2587 = vrot.lane.b32.xlu2 %v2576_v27, %s2712_s26 }
 0x303   : > { %2582 = vrot.lane.b32.xlu1 %v2571_v25, %s2710_s24 }
 0x304   : > { %v1503_v53 = vrot.slane %v1487_v33, 7 }
 0x305   : > { %v1454_v39 = vpop.f32.mrf.mxu1 }
 0x306   : > { %v3575_v63 = vsel %vm1011_vm12, 0.0, %v1503_v53  ;;  %v1527_v3 = vsel %vm1011_vm12, %v1503_v53, 0.0  ;;  %v1471_v4 = vmul.f32 %v3540_v60, %v1454_v39 }
 0x307   : > { %v1554_v6 = vrot.slane %v1527_v3, 1  ;;  %v1596_v31 = vrot.slane %v1527_v3, 2  ;;  %v2591_v5 = vpack.i.bf16 %v3575_v63, %v3555_v7  ;;  %v1595_v10 = vrot.slane %v3575_v63, 2 }
 0x308   : > { %v1480_v61 = vadd.f32 %v3543_v52, %v1471_v4  ;;  %v1553_v11 = vrot.slane %v3575_v63, 1 }
 0x309   : > { %2592 = vrot.lane.b32.xlu0 %v2591_v5, %s2717_s13  ;;  %v1597_v13 = vsel %vm1094_vm13, %v1595_v10, %v1596_v31 }
 0x30a   : > { %v1488_v9 = vmax.f32 %v1480_v61, 0.0  ;;  %v2601_v62 = vpack.i.bf16 %v1597_v13, %v1594_v54  ;;  %v1555_v18 = vsel %vm295_vm0, %v1553_v11, %v1554_v6 }
 0x30b   : > { %v2596_v15 = vpack.i.bf16 %v1555_v18, %v1552_v57 }
 0x30c   : > { %v1504_v17 = vrot.slane %v1488_v9, 7  ;;  %2602 = vrot.lane.b32.xlu2 %v2601_v62, %s2719_s15 }
 0x30d   : > { %2597 = vrot.lane.b32.xlu1 %v2596_v15, %s2718_s14 }
 0x30e   : > { %v3590_v29 = vsel %vm1011_vm12, 0.0, %v1504_v17  ;;  %v1528_v35 = vsel %vm1011_vm12, %v1504_v17, 0.0 }
 0x30f   : > { %v1557_v45 = vrot.slane %v1528_v35, 1  ;;  %v1599_v19 = vrot.slane %v1528_v35, 2  ;;  %v1598_v24 = vrot.slane %v3590_v29, 2  ;;  %v1556_v49 = vrot.slane %v3590_v29, 1 }
 0x310   : > { %v2606_v30 = vpack.i.bf16 %v3590_v29, %v3575_v63 }
 0x311   : > { %v1600_v34 = vsel %vm1094_vm13, %v1598_v24, %v1599_v19  ;;  %v1558_v42 = vsel %vm295_vm0, %v1556_v49, %v1557_v45 }
 0x312   : > { %v2616_v41 = vpack.i.bf16 %v1600_v34, %v1597_v13  ;;  %v2611_v21 = vpack.i.bf16 %v1558_v42, %v1555_v18 }
 0x314   : > { %2607 = vrot.lane.b32.xlu2 %v2606_v30, %s2713_s27  ;;  %2612 = vrot.lane.b32.xlu0 %v2611_v21, %s2714_s28 }
 0x315   : > { %2617 = vrot.lane.b32.xlu1 %v2616_v41, %s2711_s25  ;;  %v1457_v51 = vpop.f32.mrf.mxu1 }
 0x316   : > { %v1472_v32 = vmul.f32 %v3540_v60, %v1457_v51 }
 0x318   : > { %v1481_v43 = vadd.f32 %v3543_v52, %v1472_v32 }
 0x31a   : > { %v1489_v40 = vmax.f32 %v1481_v43, 0.0 }
 0x31c   : > { %v1505_v20 = vrot.slane %v1489_v40, 7  ;;  %2622 = vrot.lane.b32.xlu0 %v2611_v21, %s2710_s24 }
 0x31d   : > { %2627 = vrot.lane.b32.xlu1 %v2616_v41, %s2712_s26  ;;  %v1459_v48 = vpop.f32.mrf.mxu1 }
 0x31e   : > { %v3607_v1 = vsel %vm1011_vm12, 0.0, %v1505_v20  ;;  %v1529_v54 = vsel %vm1011_vm12, %v1505_v20, 0.0  ;;  %v1473_v27 = vmul.f32 %v3540_v60, %v1459_v48 }
 0x31f   : > { %v1560_v56 = vrot.slane %v1529_v54, 1  ;;  %v1602_v57 = vrot.slane %v1529_v54, 2  ;;  %v2631_v25 = vpack.i.bf16 %v3607_v1, %v3590_v29  ;;  %v1601_v28 = vrot.slane %v3607_v1, 2 }
 0x320   : > { %v1482_v59 = vadd.f32 %v3543_v52, %v1473_v27  ;;  %v1559_v55 = vrot.slane %v3607_v1, 1 }
 0x321   : > { %2632 = vrot.lane.b32.xlu2 %v2631_v25, %s2717_s13  ;;  %v1603_v33 = vsel %vm1094_vm13, %v1601_v28, %v1602_v57 }
 0x322   : > { %v1490_v53 = vmax.f32 %v1482_v59, 0.0  ;;  %v2641_v39 = vpack.i.bf16 %v1603_v33, %v1600_v34  ;;  %v1561_v3 = vsel %vm295_vm0, %v1559_v55, %v1560_v56  ;;  %v2183_v55 = vld [vmem:[%s3825_s3 + $0x38] sm:$0xff] }
 0x323   : > { %v2636_v4 = vpack.i.bf16 %v1561_v3, %v1558_v42  ;;  %1912 = vmatpush.bf16.msra.mxu2 %v2183_v55 }
 0x324   : > { %v1506_v6 = vrot.slane %v1490_v53, 7 }
 0x325   : > { %2642 = vrot.lane.b32.xlu1 %v2641_v39, %s2719_s15  ;;  %2637 = vrot.lane.b32.xlu0 %v2636_v4, %s2718_s14 }
 0x326   : > { %v3622_v31 = vsel %vm1011_vm12, 0.0, %v1506_v6  ;;  %v1530_v5 = vsel %vm1011_vm12, %v1506_v6, 0.0 }
 0x327   : > { %v1563_v10 = vrot.slane %v1530_v5, 1  ;;  %v1605_v61 = vrot.slane %v1530_v5, 2  ;;  %v1604_v11 = vrot.slane %v3622_v31, 2  ;;  %v1562_v13 = vrot.slane %v3622_v31, 1 }
 0x328   : > { %v2646_v35 = vpack.i.bf16 %v3622_v31, %v3607_v1 }
 0x329   : > { %v1462_v9 = vpop.f32.mrf.mxu1  ;;  %v1606_v62 = vsel %vm1094_vm13, %v1604_v11, %v1605_v61  ;;  %v1564_v17 = vsel %vm295_vm0, %v1562_v13, %v1563_v10  ;;  %v2182_v10 = vld [vmem:[%s3825_s3 + $0x30] sm:$0xff]  ;;  %v2181_v61 = vld [vmem:[%s3825_s3 + $0x28] sm:$0xff]  ;;  %v2180_v11 = vld [vmem:[%s3825_s3 + $0x20] sm:$0xff] }
 0x32a   : > { %v1474_v18 = vmul.f32 %v3540_v60, %v1462_v9  ;;  %v2656_v15 = vpack.i.bf16 %v1606_v62, %v1603_v33  ;;  %v2651_v45 = vpack.i.bf16 %v1564_v17, %v1561_v3  ;;  %1913 = vmatpush.bf16.msra.mxu2 %v2182_v10  ;;  %v2179_v13 = vld [vmem:[%s3825_s3 + $0x18] sm:$0xff]  ;;  %v2178_v9 = vld [vmem:[%s3825_s3 + $0x10] sm:$0xff] }
 0x32c   : > { %v1483_v19 = vadd.f32 %v3543_v52, %v1474_v18  ;;  %2652 = vrot.lane.b32.xlu2 %v2651_v45, %s2714_s28 }
 0x32d   : > { %2647 = vrot.lane.b32.xlu1 %v2646_v35, %s2713_s27  ;;  %2657 = vrot.lane.b32.xlu0 %v2656_v15, %s2711_s25 }
 0x32e   : > { %v1491_v24 = vmax.f32 %v1483_v19, 0.0  ;;  %1914 = vmatpush.bf16.msra.mxu2 %v2181_v61 }
 0x330   : > { %v1507_v49 = vrot.slane %v1491_v24, 7 }
 0x331   : > { %v1464_v34 = vpop.f32.mrf.mxu1 }
 0x332   : > { %v3637_v30 = vsel %vm1011_vm12, 0.0, %v1507_v49  ;;  %v1531_v41 = vsel %vm1011_vm12, %v1507_v49, 0.0  ;;  %v1475_v42 = vmul.f32 %v3540_v60, %v1464_v34  ;;  %1915 = vmatpush.bf16.msra.mxu2 %v2180_v11 }
 0x333   : > { %v2671_v21 = vpack.i.bf16 %v3637_v30, %v3622_v31  ;;  %v1608_v51 = vrot.slane %v1531_v41, 2  ;;  %v1607_v43 = vrot.slane %v3637_v30, 2  ;;  %v1566_v40 = vrot.slane %v1531_v41, 1 }
 0x334   : > { %v1484_v32 = vadd.f32 %v3543_v52, %v1475_v42  ;;  %v1565_v20 = vrot.slane %v3637_v30, 1  ;;  %2662 = vrot.lane.b32.xlu2 %v2651_v45, %s2710_s24 }
 0x335   : > { %2667 = vrot.lane.b32.xlu0 %v2656_v15, %s2712_s26  ;;  %2672 = vrot.lane.b32.xlu1 %v2671_v21, %s2717_s13  ;;  %v1609_v60 = vsel %vm1094_vm13, %v1607_v43, %v1608_v51  ;;  %v2176_v15 = vld [vmem:[%s3825_s3] sm:$0xff] }
 0x336   : > { %v1492_v48 = vmax.f32 %v1484_v32, 0.0  ;;  %v1567_v27 = vsel %vm295_vm0, %v1565_v20, %v1566_v40  ;;  %v2681_v57 = vpack.i.bf16 %v1609_v60, %v1606_v62  ;;  %1916 = vmatpush.bf16.msra.mxu2 %v2179_v13  ;;  %v2177_v62 = vld [vmem:[%s3825_s3 + $0x8] sm:$0xff] }
 0x337   : > { %v2676_v28 = vpack.i.bf16 %v1567_v27, %v1564_v17 }
 0x338   : > { %v1508_v54 = vrot.slane %v1492_v48, 7 }
 0x33a   : > { %v1524_v56 = vsel %vm1011_vm12, 0.0, %v1508_v54  ;;  %v1532_v52 = vsel %vm1011_vm12, %v1508_v54, 0.0  ;;  %1917 = vmatpush.bf16.msra.mxu2 %v2178_v9 }
 0x33b   : > { %v1658_v25 = vrot.slane %v1532_v52, 1  ;;  %v1657_v59 = vrot.slane %v1524_v56, 1  ;;  %v2686_v53 = vpack.i.bf16 %v1524_v56, %v3637_v30  ;;  %v1685_v3 = vrot.slane %v1532_v52, 2 }
 0x33c   : > { %2677 = vrot.lane.b32.xlu2 %v2676_v28, %s2718_s14  ;;  %v1684_v4 = vrot.slane %v1524_v56, 2 }
 0x33d   : > { %2682 = vrot.lane.b32.xlu0 %v2681_v57, %s2719_s15  ;;  %1580 = vrot.lane.b32.xlu1 %v1567_v27, %s2714_s28  ;;  %v1659_v33 = vsel %vm295_vm0, %v1657_v59, %v1658_v25 }
 0x33e   : > { %v2691_v39 = vpack.i.bf16 %v1659_v33, %v1567_v27  ;;  %v1686_v6 = vsel %vm1094_vm13, %v1684_v4, %v1685_v3  ;;  %1918 = vmatpush.bf16.msra.mxu2 %v2177_v62 }
 0x33f   : > { %v2696_v5 = vpack.i.bf16 %v1686_v6, %v1609_v60 }
 0x342   : > { %1919 = vmatpush.bf16.msra.mxu2 %v2176_v15 }
 0x344   : > { %1622 = vrot.lane.b32.xlu2 %v1609_v60, %s2711_s25 }
 0x345   : > { %2687 = vrot.lane.b32.xlu0 %v2686_v53, %s2713_s27  ;;  %2692 = vrot.lane.b32.xlu1 %v2691_v39, %s2710_s24 }
 0x34c   : > { %2697 = vrot.lane.b32.xlu2 %v2696_v5, %s2712_s26 }
 0x34d   : > { %1723 = vrot.lane.b32.xlu0 %v1524_v56, %s2717_s13  ;;  %1744 = vrot.lane.b32.xlu1 %v1659_v33, %s2718_s14 }
 0x354   : > { %1765 = vrot.lane.b32.xlu2 %v1686_v6, %s2719_s15  ;;  %v2578_v18 = vpop.permute.xlu2 %2577 }
 0x355   : > { %v2579_v41 = vunpack.i.l.bf16 %v2578_v18 }
 0x35c   : > { %v2588_v17 = vpop.permute.xlu2 %2587 }
 0x35d   : > { %v2590_v56 = vunpack.i.h.bf16 %v2588_v17  ;;  %v2589_v52 = vunpack.i.l.bf16 %v2588_v17 }
 0x366   : > { %v2603_v24 = vpop.permute.xlu2 %2602 }
 0x367   : > { %v2605_v53 = vunpack.i.h.bf16 %v2603_v24 }
 0x369   : > { %v2568_v19 = vpop.permute.xlu0 %2567 }
 0x36a   : > { %v2569_v42 = vunpack.i.l.bf16 %v2568_v19  ;;  %v2570_v43 = vunpack.i.h.bf16 %v2568_v19 }
 0x36c   : > { %v1788_v20 = vsel %vm662_vm5, %v3436_v14, %v2569_v42  ;;  %v2604_v14 = vunpack.i.l.bf16 %v2603_v24  ;;  %v2580_v24 = vunpack.i.h.bf16 %v2578_v18 }
 0x36d   : > { %v2573_v35 = vpop.permute.xlu1 %2572 }
 0x36e   : > { %v2574_v45 = vunpack.i.l.bf16 %v2573_v35  ;;  %v2608_v57 = vpop.permute.xlu2 %2607  ;;  %v2575_v62 = vunpack.i.h.bf16 %v2573_v35 }
 0x370   : > { %v1774_v49 = vsel %vm594_vm1, %v3550_v36, %v2574_v45  ;;  %v1775_v45 = vsel %vm594_vm1, %v3555_v7, %v2575_v62 }
 0x371   : > { %v1781_v21 = vsel %vm628_vm3, %v1774_v49, %v2579_v41  ;;  %v2609_v49 = vunpack.i.l.bf16 %v2608_v57  ;;  %v1782_v41 = vsel %vm628_vm3, %v1775_v45, %v2580_v24 }
 0x372   : > { %v1789_v48 = vsel %vm662_vm5, %v1781_v21, %v2570_v43 }
 0x375   : > { %v2583_v34 = vpop.permute.xlu1 %2582 }
 0x376   : > { %v2585_v51 = vunpack.i.h.bf16 %v2583_v34  ;;  %v2584_v32 = vunpack.i.l.bf16 %v2583_v34 }
 0x378   : > { %v1796_v54 = vsel %vm696_vm7, %v1788_v20, %v2584_v32  ;;  %v1797_v60 = vsel %vm696_vm7, %v1789_v48, %v2585_v51  ;;  %v2610_v32 = vunpack.i.h.bf16 %v2608_v57 }
 0x379   : > { %v1804_v28 = vsel %vm730_vm9, %v1796_v54, %v2589_v52  ;;  %v1805_v59 = vsel %vm730_vm9, %v1797_v60, %v2590_v56 }
 0x37b   : > { %v2593_v40 = vpop.permute.xlu0 %2592  ;;  %v2633_v11 = vpop.permute.xlu2 %2632 }
 0x37c   : > { %v2595_v27 = vunpack.i.h.bf16 %v2593_v40  ;;  %v2594_v36 = vunpack.i.l.bf16 %v2593_v40  ;;  %v1790_v40 = vsel %vm662_vm5, %v1782_v41, %v2609_v49 }
 0x37e   : > { %v1813_v39 = vsel %vm796_vm11, %v1805_v59, %v2595_v27  ;;  %v1812_v3 = vsel %vm796_vm11, %v1804_v28, %v2594_v36  ;;  %v2635_v27 = vunpack.i.h.bf16 %v2633_v11  ;;  %v2634_v36 = vunpack.i.l.bf16 %v2633_v11 }
 0x37f   : > { %v2598_v25 = vpop.permute.xlu1 %2597 }
 0x380   : > { %v2600_v55 = vunpack.i.h.bf16 %v2598_v25  ;;  %v2599_v33 = vunpack.i.l.bf16 %v2598_v25 }
 0x382   : > { %v1821_v4 = vsel %vm1343_vm14, %v1813_v39, %v2600_v55  ;;  %v1820_v6 = vsel %vm1343_vm14, %v1812_v3, %v2599_v33 }
 0x383   : > { %v1828_v5 = vsel %vm1352_vm15, %v1820_v6, %v2604_v14  ;;  %v1829_v10 = vsel %vm1352_vm15, %v1821_v4, %v2605_v53 }
 0x384   : > { %v2151_v61 = vpack.c.bf16 %v1829_v10, %v1828_v5 }
 0x386   : > { %2152 = vmatmul.msk.bf16.vlgmr.msra.gmra.mxu2 %vm3451_vm4, %v2151_v61  ;;  %v2613_v9 = vpop.permute.xlu0 %2612  ;;  %v3712_v34 = vpop.permute.xlu2 %2652 }
 0x387   : > { %v2618_v13 = vpop.permute.xlu1 %2617  ;;  %v2614_v15 = vunpack.i.l.bf16 %v2613_v9  ;;  %v2615_v5 = vunpack.i.h.bf16 %v2613_v9  ;;  %v2654_v10 = vunpack.i.l.bf16 %v3712_v34 }
 0x388   : > { %v2619_v17 = vunpack.i.l.bf16 %v2618_v13 }
 0x389   : > { %v1776_v19 = vsel %vm594_vm1, %v3575_v63, %v2614_v15  ;;  %v2620_v15 = vunpack.i.h.bf16 %v2618_v13  ;;  %v1777_v45 = vsel %vm594_vm1, %v3590_v29, %v2615_v5 }
 0x38a   : > { %v1783_v42 = vsel %vm628_vm3, %v1776_v19, %v2619_v17  ;;  %v1778_v19 = vsel %vm594_vm1, %v3607_v1, %v2654_v10 }
 0x38b   : > { %v1791_v48 = vsel %vm662_vm5, %v1783_v42, %v2610_v32  ;;  %v1784_v42 = vsel %vm628_vm3, %v1777_v45, %v2620_v15 }
 0x38e   : > { %v2623_v51 = vpop.permute.xlu0 %2622  ;;  %v2663_v57 = vpop.permute.xlu2 %2662 }
 0x38f   : > { %v2628_v21 = vpop.permute.xlu1 %2627  ;;  %v2625_v35 = vunpack.i.h.bf16 %v2623_v51  ;;  %v2624_v43 = vunpack.i.l.bf16 %v2623_v51  ;;  %v2665_v13 = vunpack.i.h.bf16 %v2663_v57 }
 0x390   : > { %v2630_v20 = vunpack.i.h.bf16 %v2628_v21  ;;  %v2629_v7 = vunpack.i.l.bf16 %v2628_v21 }
 0x391   : > { %v1798_v63 = vsel %vm696_vm7, %v1790_v40, %v2624_v43  ;;  %v1799_v18 = vsel %vm696_vm7, %v1791_v48, %v2625_v35  ;;  %v2664_v35 = vunpack.i.l.bf16 %v2663_v57 }
 0x392   : > { %v1806_v54 = vsel %vm730_vm9, %v1798_v63, %v2629_v7  ;;  %v1807_v60 = vsel %vm730_vm9, %v1799_v18, %v2630_v20 }
 0x393   : > { %v1814_v33 = vsel %vm796_vm11, %v1806_v54, %v2634_v36  ;;  %v1815_v53 = vsel %vm796_vm11, %v1807_v60, %v2635_v27 }
 0x396   : > { %v2678_v17 = vpop.permute.xlu2 %2677 }
 0x397   : > { %v2643_v56 = vpop.permute.xlu1 %2642  ;;  %v2638_v52 = vpop.permute.xlu0 %2637  ;;  %v2680_v27 = vunpack.i.h.bf16 %v2678_v17  ;;  %v2679_v36 = vunpack.i.l.bf16 %v2678_v17 }
 0x398   : > { %v2645_v25 = vunpack.i.h.bf16 %v2643_v56  ;;  %v2644_v28 = vunpack.i.l.bf16 %v2643_v56  ;;  %v2640_v59 = vunpack.i.h.bf16 %v2638_v52  ;;  %v2639_v55 = vunpack.i.l.bf16 %v2638_v52 }
 0x39a   : > { %v1823_v14 = vsel %vm1343_vm14, %v1815_v53, %v2640_v59  ;;  %v1822_v39 = vsel %vm1343_vm14, %v1814_v33, %v2639_v55  ;;  %v2655_v53 = vunpack.i.h.bf16 %v3712_v34 }
 0x39b   : > { %v1830_v3 = vsel %vm1352_vm15, %v1822_v39, %v2644_v28  ;;  %v1831_v4 = vsel %vm1352_vm15, %v1823_v14, %v2645_v25 }
 0x39c   : > { %v2154_v6 = vpack.c.bf16 %v1831_v4, %v1830_v3 }
 0x39e   : > { %2155 = vmatmul.msk.bf16.gmra.mxu2 %vm3451_vm4, %v2154_v6  ;;  %v1623_v18 = vpop.permute.xlu2 %1622  ;;  %v1779_v6 = vsel %vm594_vm1, %v3622_v31, %v2655_v53 }
 0x39f   : > { %v2648_v61 = vpop.permute.xlu1 %2647  ;;  %v2658_v11 = vpop.permute.xlu0 %2657 }
 0x3a0   : > { %v2659_v62 = vunpack.i.l.bf16 %v2658_v11  ;;  %v2650_v24 = vunpack.i.h.bf16 %v2648_v61  ;;  %v2649_v49 = vunpack.i.l.bf16 %v2648_v61  ;;  %v2660_v39 = vunpack.i.h.bf16 %v2658_v11 }
 0x3a2   : > { %v1785_v41 = vsel %vm628_vm3, %v1778_v19, %v2659_v62  ;;  %v1792_v9 = vsel %vm662_vm5, %v1784_v42, %v2649_v49  ;;  %v1786_v34 = vsel %vm628_vm3, %v1779_v6, %v2660_v39 }
 0x3a3   : > { %v1793_v21 = vsel %vm662_vm5, %v1785_v41, %v2650_v24  ;;  %v1800_v29 = vsel %vm696_vm7, %v1792_v9, %v2664_v35 }
 0x3a4   : > { %v1801_v1 = vsel %vm696_vm7, %v1793_v21, %v2665_v13 }
 0x3a6   : > { %v2698_v3 = vpop.permute.xlu2 %2697 }
 0x3a7   : > { %v2668_v51 = vpop.permute.xlu0 %2667  ;;  %v2673_v32 = vpop.permute.xlu1 %2672  ;;  %v2700_v45 = vunpack.i.h.bf16 %v2698_v3  ;;  %v2699_v41 = vunpack.i.l.bf16 %v2698_v3 }
 0x3a8   : > { %v2670_v43 = vunpack.i.h.bf16 %v2668_v51  ;;  %v2669_v40 = vunpack.i.l.bf16 %v2668_v51  ;;  %v2675_v20 = vunpack.i.h.bf16 %v2673_v32  ;;  %v2674_v7 = vunpack.i.l.bf16 %v2673_v32 }
 0x3aa   : > { %v1808_v48 = vsel %vm730_vm9, %v1800_v29, %v2669_v40  ;;  %v1809_v63 = vsel %vm730_vm9, %v1801_v1, %v2670_v43  ;;  %v1950_v29 = vperm.slane %v2701_v38, 5 }
 0x3ab   : > { %v1817_v54 = vsel %vm796_vm11, %v1809_v63, %v2675_v20  ;;  %v1816_v60 = vsel %vm796_vm11, %v1808_v48, %v2674_v7 }
 0x3ac   : > { %v1824_v28 = vsel %vm1343_vm14, %v1816_v60, %v2679_v36  ;;  %v1825_v59 = vsel %vm1343_vm14, %v1817_v54, %v2680_v27 }
 0x3ae   : > { %v1766_v35 = vpop.permute.xlu2 %1765 }
 0x3af   : > { %v2683_v56 = vpop.permute.xlu0 %2682  ;;  %v1581_v52 = vpop.permute.xlu1 %1580 }
 0x3b0   : > { %v2685_v57 = vunpack.i.h.bf16 %v2683_v56  ;;  %v2684_v25 = vunpack.i.l.bf16 %v2683_v56  ;;  %v1780_v4 = vsel %vm594_vm1, %v3637_v30, %v1581_v52 }
 0x3b1   : > { %v1787_v11 = vsel %vm628_vm3, %v1780_v4, %v1623_v18 }
 0x3b2   : > { %v1832_v55 = vsel %vm1352_vm15, %v1824_v28, %v2684_v25  ;;  %v1833_v33 = vsel %vm1352_vm15, %v1825_v59, %v2685_v57 }
 0x3b3   : > { %v2157_v14 = vpack.c.bf16 %v1833_v33, %v1832_v55 }
 0x3b5   : > { %2158 = vmatmul.msk.bf16.gmra.mxu2 %vm3451_vm4, %v2157_v14 }
 0x3b7   : > { %v2688_v5 = vpop.permute.xlu0 %2687  ;;  %v2693_v10 = vpop.permute.xlu1 %2692 }
 0x3b8   : > { %v2690_v61 = vunpack.i.h.bf16 %v2688_v5  ;;  %v2689_v62 = vunpack.i.l.bf16 %v2688_v5  ;;  %v2695_v15 = vunpack.i.h.bf16 %v2693_v10  ;;  %v2694_v17 = vunpack.i.l.bf16 %v2693_v10 }
 0x3ba   : > { %v1795_v19 = vsel %vm662_vm5, %v1787_v11, %v2690_v61  ;;  %v1794_v24 = vsel %vm662_vm5, %v1786_v34, %v2689_v62 }
 0x3bb   : > { %v1803_v30 = vsel %vm696_vm7, %v1795_v19, %v2695_v15  ;;  %v1802_v31 = vsel %vm696_vm7, %v1794_v24, %v2694_v17 }
 0x3bc   : > { %v1811_v49 = vsel %vm730_vm9, %v1803_v30, %v2700_v45  ;;  %v1810_v21 = vsel %vm730_vm9, %v1802_v31, %v2699_v41 }
 0x3bd   : > { %v1819_v42 = vsel %vm796_vm11, %v1811_v49, %v2555_v50 }
 0x3be   : > { %v1827_v32 = vsel %vm1343_vm14, %v1819_v42, %v2560_v22  ;;  %v1941_v22 = vperm.slane %v2701_v38, 4 }
 0x3bf   : > { %v1724_v9 = vpop.permute.xlu0 %1723  ;;  %v1745_v51 = vpop.permute.xlu1 %1744  ;;  %v1835_v0 = vsel %vm1352_vm15, %v1827_v32, %v2565_v26 }
 0x3c0   : > { %v1818_v13 = vsel %vm796_vm11, %v1810_v21, %v1724_v9 }
 0x3c1   : > { %v1826_v43 = vsel %vm1343_vm14, %v1818_v13, %v1745_v51 }
 0x3c2   : > { %v1834_v40 = vsel %vm1352_vm15, %v1826_v43, %v1766_v35 }
 0x3c3   : > { %v2160_v50 = vpack.c.bf16 %v1835_v0, %v1834_v40 }
 0x3c5   : > { %2161 = vmatmul.msk.bf16.gmra.mxu2 %vm3451_vm4, %v2160_v50 }
 0x409   : > { %v1921_v1 = vpop.f32.mrf.mxu2 }
 0x40a   : > { %v1942_v20 = vmul.f32 %v1941_v22, %v1921_v1 }
 0x40c   : > { %v1951_v7 = vadd.f32 %v1950_v29, %v1942_v20 }
 0x40e   : > { %v1959_v48 = vadd.f32 %v1951_v7, %v3236_v2 }
 0x410   : > { %v1967_v63 = vmax.f32 %v1959_v48, 0.0 }
 0x411   : > { %v1923_v58 = vpop.f32.mrf.mxu2 }
 0x412   : > { %v1975_v37 = vadd.f32 %v1967_v63, %v3236_v2  ;;  %v1943_v26 = vmul.f32 %v1941_v22, %v1923_v58 }
 0x414   : > { %1983 = vst.msk [vmem:[%s3786_s12] sm:$0xff] %vm594_vm1, %v1975_v37  ;;  %v1952_v18 = vadd.f32 %v1950_v29, %v1943_v26 }
 0x416   : > { %v1960_v54 = vadd.f32 %v1952_v18, %v3263_v23 }
 0x418   : > { %v1968_v60 = vmax.f32 %v1960_v54, 0.0 }
 0x41a   : > { %v1976_v27 = vadd.f32 %v1968_v60, %v3263_v23 }
 0x41c   : > { %1984 = vst.msk [vmem:[%s3786_s12 + $0x8] sm:$0xff] %vm594_vm1, %v1976_v27 }
 0x421   : > { %v1926_v36 = vpop.f32.mrf.mxu2 }
 0x422   : > { %v1944_v56 = vmul.f32 %v1941_v22, %v1926_v36 }
 0x424   : > { %v1953_v52 = vadd.f32 %v1950_v29, %v1944_v56 }
 0x426   : > { %v1961_v57 = vadd.f32 %v1953_v52, %v3279_v46 }
 0x428   : > { %v1969_v25 = vmax.f32 %v1961_v57, 0.0 }
 0x429   : > { %v1928_v2 = vpop.f32.mrf.mxu2 }
 0x42a   : > { %v1977_v28 = vadd.f32 %v1969_v25, %v3279_v46  ;;  %v1945_v59 = vmul.f32 %v1941_v22, %v1928_v2 }
 0x42c   : > { %1985 = vst.msk [vmem:[%s3786_s12 + $0x10] sm:$0xff] %vm594_vm1, %v1977_v28  ;;  %v1954_v55 = vadd.f32 %v1950_v29, %v1945_v59 }
 0x42e   : > { %v1962_v33 = vadd.f32 %v1954_v55, %v3305_v8 }
 0x430   : > { %v1970_v53 = vmax.f32 %v1962_v33, 0.0 }
 0x432   : > { %v1978_v23 = vadd.f32 %v1970_v53, %v3305_v8 }
 0x434   : > { %1986 = vst.msk [vmem:[%s3786_s12 + $0x18] sm:$0xff] %vm594_vm1, %v1978_v23 }
 0x438   : > { %v1931_v14 = vpop.f32.mrf.mxu2 }
 0x439   : > { %v1946_v39 = vmul.f32 %v1941_v22, %v1931_v14 }
 0x43b   : > { %v1955_v3 = vadd.f32 %v1950_v29, %v1946_v39 }
 0x43d   : > { %v1963_v4 = vadd.f32 %v1955_v3, %v3338_v12 }
 0x43f   : > { %v1971_v6 = vmax.f32 %v1963_v4, 0.0 }
 0x440   : > { %v1933_v46 = vpop.f32.mrf.mxu2 }
 0x441   : > { %v1979_v5 = vadd.f32 %v1971_v6, %v3338_v12  ;;  %v1947_v10 = vmul.f32 %v1941_v22, %v1933_v46 }
 0x443   : > { %1987 = vst.msk [vmem:[%s3786_s12 + $0x20] sm:$0xff] %vm594_vm1, %v1979_v5  ;;  %v1956_v61 = vadd.f32 %v1950_v29, %v1947_v10 }
 0x445   : > { %v1964_v62 = vadd.f32 %v1956_v61, %v3328_v44 }
 0x447   : > { %v1972_v8 = vmax.f32 %v1964_v62, 0.0 }
 0x448   : > { %v1936_v15 = vpop.f32.mrf.mxu2 }
 0x449   : > { %v1980_v17 = vadd.f32 %v1972_v8, %v3328_v44  ;;  %v1948_v34 = vmul.f32 %v1941_v22, %v1936_v15 }
 0x44b   : > { %1988 = vst.msk [vmem:[%s3786_s12 + $0x28] sm:$0xff] %vm594_vm1, %v1980_v17  ;;  %v1957_v11 = vadd.f32 %v1950_v29, %v1948_v34 }
 0x44d   : > { %v1965_v45 = vadd.f32 %v1957_v11, %v3330_v47 }
 0x44f   : > { %v1973_v19 = vmax.f32 %v1965_v45, 0.0 }
 0x450   : > { %v1938_v12 = vpop.f32.mrf.mxu2 }
 0x451   : > { %v1981_v24 = vadd.f32 %v1973_v19, %v3330_v47  ;;  %v1949_v30 = vmul.f32 %v1941_v22, %v1938_v12 }
 0x453   : > { %1989 = vst.msk [vmem:[%s3786_s12 + $0x30] sm:$0xff] %vm594_vm1, %v1981_v24  ;;  %v1958_v49 = vadd.f32 %v1950_v29, %v1949_v30 }
 0x455   : > { %v1966_v31 = vadd.f32 %v1958_v49, %v3377_v16 }
 0x457   : > { %v1974_v41 = vmax.f32 %v1966_v31, 0.0 }
 0x459   : > { %v1982_v42 = vadd.f32 %v1974_v41, %v3377_v16 }
 0x45b   : > { %1990 = vst.msk [vmem:[%s3786_s12 + $0x38] sm:$0xff] %vm594_vm1, %v1982_v42 }
 0x45c PF: > { %s15_s18 = sadd.s32 1, %s2708_s18  }
 0x45d   : > { %p12_p4 = scmp.ge.s32.totalorder %s15_s18, 4  }
 0x45f   :  { %14 = sbr.rel (!%p12_p4) target bundleno = 1 (0x1), region = 70 }

</bundles_post_ra>
